<compile_context>
chip_gen: v7x
topology: tpu7x:2x2x1
jax: 0.10.0
libtpu: 0.0.40
codegen_flags: <defaults>
</compile_context>

<pallas_src>
import jax
import jax.numpy as jnp
from jax.experimental import pallas as pl
from jax.experimental.pallas import tpu as pltpu


def _round_up(x, m):
    return (x + m - 1) // m * m


# ---------------------------------------------------------------------------
# Fused matmul + folded-BN + ReLU kernel:  out = relu((X @ W) * scale + shift)
# Single K block for every layer (all convs, fc1 and fc2); grid = (N_tiles,).
# MXU operands are bf16; accumulation and BN/ReLU epilogue are f32; the store
# dtype follows the output ref (bf16 activations, f32 for the final fc2).
# ---------------------------------------------------------------------------
def _mm_bn_relu_kernel(x_ref, w_ref, s_ref, b_ref, o_ref):
    y = jnp.dot(x_ref[...], w_ref[...], preferred_element_type=jnp.float32)
    y = y * s_ref[...] + b_ref[...]
    o_ref[...] = jnp.maximum(y, 0.0).astype(o_ref.dtype)


def matmul_bn_relu(x, w, scale, shift, tn=None, out_dtype=jnp.bfloat16,
                   vmem_limit_bytes=None):
    """relu((x @ w) * scale + shift).  x: (M,K), w: (K,N), scale/shift: (N,)."""
    M, K = x.shape
    Kw, N = w.shape
    assert K == Kw

    # Layout alignment: pad M up to a bf16 sublane-pack multiple (16); pad a
    # ragged K (conv1: 363 -> 384) up to a full lane tile.  Zero padding is
    # exact (padded rows/columns contribute zero to the dot product).
    Mp = _round_up(M, 16)
    if Mp != M:
        x = jnp.pad(x, ((0, Mp - M), (0, 0)))
    if K % 128 != 0:
        Kp = _round_up(K, 128)
        x = jnp.pad(x, ((0, 0), (0, Kp - K)))
        w = jnp.pad(w, ((0, Kp - K), (0, 0)))
        K = Kp

    tn = N if tn is None else tn
    assert N % tn == 0
    n_tiles = N // tn

    x = x.astype(jnp.bfloat16)          # bf16 operands -> single-pass MXU
    w = w.astype(jnp.bfloat16)
    scale2 = scale.reshape(1, N).astype(jnp.float32)
    shift2 = shift.reshape(1, N).astype(jnp.float32)

    cparams = dict(dimension_semantics=("parallel",))
    if vmem_limit_bytes is not None:
        cparams["vmem_limit_bytes"] = vmem_limit_bytes

    out = pl.pallas_call(
        _mm_bn_relu_kernel,
        out_shape=jax.ShapeDtypeStruct((Mp, N), out_dtype),
        grid_spec=pltpu.PrefetchScalarGridSpec(
            num_scalar_prefetch=0,
            grid=(n_tiles,),
            in_specs=[
                pl.BlockSpec((Mp, K), lambda j: (0, 0)),   # LHS resident
                pl.BlockSpec((K, tn), lambda j: (0, j)),   # weight stream
                pl.BlockSpec((1, tn), lambda j: (0, j)),
                pl.BlockSpec((1, tn), lambda j: (0, j)),
            ],
            out_specs=pl.BlockSpec((Mp, tn), lambda j: (0, j)),
        ),
        compiler_params=pltpu.CompilerParams(**cparams),
    )(x, w, scale2, shift2)

    return out if Mp == M else out[:M]


# ---------------------------------------------------------------------------
# MaxPool2d(kernel_size=3, stride=2) on NHWC.
# The 9 shifted strided taps are extracted in plain JAX (same slicing pattern
# as im2col); the Pallas kernel reduces them with 8 vector maximums on
# whole-VMEM blocks (no strided / integer ref indexing inside the kernel).
# ---------------------------------------------------------------------------
def maxpool3x3s2(x):
    N, H, W, C = x.shape
    OH = (H - 3) // 2 + 1
    OW = (W - 3) // 2 + 1

    # TODO(synk): tap extraction is plain-JAX glue; fuse into the kernel (or
    # the preceding conv epilogue) to drop one HBM round trip per pool.
    taps = [
        jax.lax.slice(
            x, (0, di, dj, 0),
            (N, di + 2 * (OH - 1) + 1, dj + 2 * (OW - 1) + 1, C),
            (1, 2, 2, 1))
        for di in range(3) for dj in range(3)
    ]

    def kernel(*refs):
        o_ref = refs[-1]
        m = refs[0][...]
        for r in refs[1:-1]:
            m = jnp.maximum(m, r[...])
        o_ref[...] = m

    return pl.pallas_call(
        kernel,
        out_shape=jax.ShapeDtypeStruct((N, OH, OW, C), x.dtype),
        in_specs=[pl.BlockSpec(memory_space=pltpu.MemorySpace.VMEM)] * 9,
        out_specs=pl.BlockSpec(memory_space=pltpu.MemorySpace.VMEM),
    )(*taps)


# ---------------------------------------------------------------------------
# Conv2d (+BN+ReLU) via im2col (glue) + fused Pallas matmul kernel.
# ---------------------------------------------------------------------------
def _im2col(x, kh, kw, stride, pad):
    """x: (N,H,W,C) -> (N*OH*OW, KH*KW*C); patch element order = (kh, kw, c)."""
    x = jnp.pad(x, ((0, 0), (pad, pad), (pad, pad), (0, 0)))
    N, Hp, Wp, C = x.shape
    oh = (Hp - kh) // stride + 1
    ow = (Wp - kw) // stride + 1
    cols = []
    for i in range(kh):
        for j in range(kw):
            cols.append(
                jax.lax.slice(
                    x, (0, i, j, 0),
                    (N, i + stride * (oh - 1) + 1, j + stride * (ow - 1) + 1, C),
                    (1, stride, stride, 1)))
    p = jnp.stack(cols, axis=3)                       # (N, oh, ow, KH*KW, C)
    return p.reshape(N * oh * ow, kh * kw * C), oh, ow


def conv_bn_relu(x, w, scale, shift, stride, pad, oc_pad=None):
    """x: (N,H,W,C), w: (KH,KW,IC,OC) -> (N,OH,OW,OC') in bf16."""
    KH, KW, IC, OC = w.shape
    N, _, _, C_in = x.shape
    # If the input was channel-padded (conv1: 64->128, conv2: 192->256), extend
    # w with zero IC rows; the padded activations are exactly zero so the
    # result is unchanged.
    if C_in != IC:
        w = jnp.pad(w, ((0, 0), (0, 0), (0, C_in - IC), (0, 0)))
        IC = C_in
    # Optionally zero-pad OC up to a full 128-lane multiple (lane-dense stores;
    # also makes the NEXT conv's K a multiple of 128).
    if oc_pad is not None and oc_pad > OC:
        w = jnp.pad(w, ((0, 0), (0, 0), (0, 0), (0, oc_pad - OC)))
        scale = jnp.pad(scale, (0, oc_pad - OC))
        shift = jnp.pad(shift, (0, oc_pad - OC))
        OC = oc_pad

    # bf16 patches (no-op cast for layers after conv1, which already store bf16).
    patches, oh, ow = _im2col(x.astype(jnp.bfloat16), KH, KW, stride, pad)
    wm = w.reshape(KH * KW * IC, OC)
    # Single grid step per conv: weight blocks are 0.03-2 MiB, so splitting
    # only adds fixed per-step overhead (especially on 1-TC v5e/v6e).
    out = matmul_bn_relu(patches, wm, scale, shift, tn=OC,
                         out_dtype=jnp.bfloat16)
    return out.reshape(N, oh, ow, OC)


# ---------------------------------------------------------------------------
# Parameters (deterministic, synthetic — mirrors the module's layer shapes).
# ---------------------------------------------------------------------------
_CONV_CFG = [  # (kernel, in_ch, out_ch, stride, pad)
    (11, 3, 64, 4, 2),
    (5, 64, 192, 1, 2),
    (3, 192, 384, 1, 1),
    (3, 384, 256, 1, 1),
    (3, 256, 256, 1, 1),
]


def _bn_fold(key, c):
    k1, k2, k3, k4 = jax.random.split(key, 4)
    gamma = jax.random.uniform(k1, (c,), jnp.float32, 0.5, 1.5)
    beta = jax.random.normal(k2, (c,), jnp.float32) * 0.1
    mean = jax.random.normal(k3, (c,), jnp.float32) * 0.1
    var = jax.random.uniform(k4, (c,), jnp.float32, 0.5, 1.5)
    eps = 1e-5
    scale = gamma / jnp.sqrt(var + eps)
    shift = beta - mean * scale
    return scale, shift


def make_params(key, pool_size):
    params = {}
    keys = jax.random.split(key, 2 * len(_CONV_CFG) + 4)
    ki = 0
    for li, (k, ic, oc, _, _) in enumerate(_CONV_CFG, start=1):
        fan_in = k * k * ic
        w = (jax.random.normal(keys[ki], (k, k, ic, oc), jnp.float32)
             * jnp.sqrt(2.0 / fan_in))
        params[f"w{li}"] = w.astype(jnp.bfloat16)   # weights stored/streamed bf16
        ki += 1
        params[f"s{li}"], params[f"b{li}"] = _bn_fold(keys[ki], oc)
        ki += 1
    fc_in = 256 * pool_size * pool_size
    params["fc1"] = (jax.random.normal(keys[ki], (fc_in, 4096), jnp.float32)
                     * jnp.sqrt(2.0 / fc_in)).astype(jnp.bfloat16)
    ki += 1
    params["fs1"], params["fb1"] = _bn_fold(keys[ki], 4096)
    ki += 1
    params["fc2"] = (jax.random.normal(keys[ki], (4096, 4096), jnp.float32)
                     * jnp.sqrt(2.0 / 4096)).astype(jnp.bfloat16)
    ki += 1
    params["fs2"], params["fb2"] = _bn_fold(keys[ki], 4096)
    return params


# ---------------------------------------------------------------------------
# Forward pass (finetune_readout=False): features -> flatten -> classifier
# ---------------------------------------------------------------------------
def alexnet_forward(x_nchw, params):
    x = jnp.transpose(x_nchw, (0, 2, 3, 1))  # NCHW -> NHWC
    # features: conv1 OC padded 64->128, conv2 OC padded 192->256.  The padded
    # channels are exactly zero and feed zero weight rows downstream, so the
    # semantics match the unpadded module.
    x = conv_bn_relu(x, params["w1"], params["s1"], params["b1"], 4, 2,
                     oc_pad=128)
    x = maxpool3x3s2(x)
    x = conv_bn_relu(x, params["w2"], params["s2"], params["b2"], 1, 2,
                     oc_pad=256)
    x = maxpool3x3s2(x)
    x = conv_bn_relu(x, params["w3"], params["s3"], params["b3"], 1, 1)
    x = conv_bn_relu(x, params["w4"], params["s4"], params["b4"], 1, 1)
    x = conv_bn_relu(x, params["w5"], params["s5"], params["b5"], 1, 1)
    x = maxpool3x3s2(x)
    # torch.flatten(x, 1) on NCHW
    x = jnp.transpose(x, (0, 3, 1, 2)).reshape(x.shape[0], -1)
    # classifier
    # fc1: K=256, weights 2 MiB -> one grid step.
    x = matmul_bn_relu(x, params["fc1"], params["fs1"], params["fb1"],
                       out_dtype=jnp.bfloat16)
    # fc2: pure weight stream (32 MiB, M=2).  Direct full-K kernel, 4 even
    # 1024-wide tiles (v7x-friendly); 2x8 MiB weight buffers need ~16.5 MiB of
    # scoped VMEM, so raise the limit to 32 MiB (safe on v5e/v6e/v7x).
    x = matmul_bn_relu(x, params["fc2"], params["fs2"], params["fb2"],
                       tn=1024, out_dtype=jnp.float32,
                       vmem_limit_bytes=32 * 1024 * 1024)
    return [x]


# ---------------------------------------------------------------------------
# Pure-JAX reference (bf16 MXU operands / f32 accumulate; f32 activations —
# the Pallas path additionally stores bf16 activations between layers, so the
# comparison tolerance is loosened accordingly).
# ---------------------------------------------------------------------------
def alexnet_reference(x_nchw, params):
    x = jnp.transpose(x_nchw, (0, 2, 3, 1))

    def conv(x, w, s, b, stride, pad):
        y = jax.lax.conv_general_dilated(
            x.astype(jnp.bfloat16), w.astype(jnp.bfloat16),
            (stride, stride), [(pad, pad), (pad, pad)],
            dimension_numbers=("NHWC", "HWIO", "NHWC"),
            preferred_element_type=jnp.float32)
        return jnp.maximum(y * s + b, 0.0)

    def pool(x):
        return jax.lax.reduce_window(
            x, -jnp.inf, jax.lax.max, (1, 3, 3, 1), (1, 2, 2, 1), "VALID")

    def fc(x, w, s, b):
        y = jnp.dot(x.astype(jnp.bfloat16), w.astype(jnp.bfloat16),
                    preferred_element_type=jnp.float32)
        return jnp.maximum(y * s + b, 0.0)

    x = conv(x, params["w1"], params["s1"], params["b1"], 4, 2); x = pool(x)
    x = conv(x, params["w2"], params["s2"], params["b2"], 1, 2); x = pool(x)
    x = conv(x, params["w3"], params["s3"], params["b3"], 1, 1)
    x = conv(x, params["w4"], params["s4"], params["b4"], 1, 1)
    x = conv(x, params["w5"], params["s5"], params["b5"], 1, 1); x = pool(x)
    x = jnp.transpose(x, (0, 3, 1, 2)).reshape(x.shape[0], -1)
    x = fc(x, params["fc1"], params["fs1"], params["fb1"])
    x = fc(x, params["fc2"], params["fs2"], params["fb2"])
    return [x]


if __name__ == "__main__":
    key = jax.random.PRNGKey(0)
    kx, kp = jax.random.split(key)

    # 63x63 input -> final feature map 1x1, so pool_size=1 (module arg) keeps
    # the classifier input (256 * pool_size**2) consistent with torch.flatten.
    pool_size = 1
    x = jax.random.normal(kx, (2, 3, 63, 63), jnp.float32)   # NCHW like PyTorch
    params = make_params(kp, pool_size)

    out = alexnet_forward(x, params)
    y = jax.block_until_ready(out[0])
    assert y.shape == (2, 4096), y.shape
    assert bool(jnp.isfinite(y).all())

    ref = alexnet_reference(x, params)[0]
    # Tolerance accounts for bf16 activation storage between layers in the
    # Pallas path (reference keeps f32 activations).
    rel_err = float(jnp.max(jnp.abs(y - ref)) / (jnp.max(jnp.abs(ref)) + 1e-6))
    assert rel_err < 1e-2, rel_err

    print("KERNEL_OK")
</pallas_src>

<mosaic_0001>
module attributes {stable_mosaic.version = 11 : i64} {
  func.func @_mm_bn_relu_kernel(%arg0: i32, %arg1: memref<464x384xbf16, #tpu.memory_space<vmem>>, %arg2: memref<384x128xbf16, #tpu.memory_space<vmem>>, %arg3: memref<1x128xf32, #tpu.memory_space<vmem>>, %arg4: memref<1x128xf32, #tpu.memory_space<vmem>>, %arg5: memref<464x128xbf16, #tpu.memory_space<vmem>>) attributes {dimension_semantics = [#tpu.dimension_semantics<parallel>], iteration_bounds = array<i64: 1>, scalar_prefetch = 0 : i64, scratch_operands = 0 : i64, tpu.core_type = #tpu.core_type<tc>, window_params = [{pipeline_mode = #tpu.pipeline_mode<synchronous>, transform_indices = @transform_0, window_bounds = array<i64: 464, 384>}, {transform_indices = @transform_1, window_bounds = array<i64: 384, 128>}, {transform_indices = @transform_2, window_bounds = array<i64: 1, 128>}, {transform_indices = @transform_3, window_bounds = array<i64: 1, 128>}, {transform_indices = @transform_4, window_bounds = array<i64: 464, 128>}]} {
    %c0 = arith.constant 0 : index
    %c0_0 = arith.constant 0 : index
    %0 = vector.load %arg1[%c0, %c0_0] : memref<464x384xbf16, #tpu.memory_space<vmem>>, vector<464x384xbf16>
    %c0_1 = arith.constant 0 : index
    %c0_2 = arith.constant 0 : index
    %1 = vector.load %arg2[%c0_1, %c0_2] : memref<384x128xbf16, #tpu.memory_space<vmem>>, vector<384x128xbf16>
    %cst = arith.constant dense<0.000000e+00> : vector<464x128xf32>
    %2 = tpu.matmul %0, %1, %cst {dimension_numbers = #tpu.dot_dimension_numbers<[1], [0], [0], [1], [0, 0, 1, 1], [], []>} : vector<464x384xbf16>, vector<384x128xbf16>, vector<464x128xf32> -> vector<464x128xf32>
    %c0_3 = arith.constant 0 : index
    %c0_4 = arith.constant 0 : index
    %3 = vector.load %arg3[%c0_3, %c0_4] : memref<1x128xf32, #tpu.memory_space<vmem>>, vector<1x128xf32>
    %4 = vector.broadcast %3 : vector<1x128xf32> to vector<464x128xf32>
    %5 = arith.mulf %2, %4 : vector<464x128xf32>
    %c0_5 = arith.constant 0 : index
    %c0_6 = arith.constant 0 : index
    %6 = vector.load %arg4[%c0_5, %c0_6] : memref<1x128xf32, #tpu.memory_space<vmem>>, vector<1x128xf32>
    %7 = vector.broadcast %6 : vector<1x128xf32> to vector<464x128xf32>
    %8 = arith.addf %5, %7 : vector<464x128xf32>
    %cst_7 = arith.constant 0.000000e+00 : f32
    %9 = vector.broadcast %cst_7 : f32 to vector<464x128xf32>
    %10 = arith.maximumf %8, %9 : vector<464x128xf32>
    %11 = arith.truncf %10 : vector<464x128xf32> to vector<464x128xbf16>
    %c0_8 = arith.constant 0 : index
    %c0_9 = arith.constant 0 : index
    %12 = vector.load %arg5[%c0_8, %c0_9] : memref<464x128xbf16, #tpu.memory_space<vmem>>, vector<464x128xbf16>
    tpu.vector_store %arg5[%c0_8, %c0_9], %11 {strides = array<i32>} : memref<464x128xbf16, #tpu.memory_space<vmem>>, vector<464x128xbf16>,
    return
  }
  func.func @transform_0(%arg0: i32) -> (i32, i32) {
    %c0_i32 = arith.constant 0 : i32
    %c0_i32_0 = arith.constant 0 : i32
    %c0_i32_1 = arith.constant 0 : i32
    return %c0_i32, %c0_i32_0 : i32, i32
  }
  func.func @transform_1(%arg0: i32) -> (i32, i32) {
    %c0_i32 = arith.constant 0 : i32
    %c0_i32_0 = arith.constant 0 : i32
    return %c0_i32, %arg0 : i32, i32
  }
  func.func @transform_2(%arg0: i32) -> (i32, i32) {
    %c0_i32 = arith.constant 0 : i32
    %c0_i32_0 = arith.constant 0 : i32
    return %c0_i32, %arg0 : i32, i32
  }
  func.func @transform_3(%arg0: i32) -> (i32, i32) {
    %c0_i32 = arith.constant 0 : i32
    %c0_i32_0 = arith.constant 0 : i32
    return %c0_i32, %arg0 : i32, i32
  }
  func.func @transform_4(%arg0: i32) -> (i32, i32) {
    %c0_i32 = arith.constant 0 : i32
    %c0_i32_0 = arith.constant 0 : i32
    return %c0_i32, %arg0 : i32, i32
  }
}

</mosaic_0001>

<bundles_post_ra>
// kernel: tpu_custom_call.1
= control target key start
LH: loop header
LB: loop body
LE: loop exit
PB: predicated region body
PF: predicated region fallthrough
CT: control target
= control target key end

     0   :  { %9 = vsyncpa [#allocation3], 0  ;;  %s2981_s0 = inlined_call_operand.hbm [shape: bf16[464,384], index: 0, kind: input, shape index: {}]   ;;  %s2982_s1 = inlined_call_operand.hbm [shape: bf16[384,128], index: 1, kind: input, shape index: {}]   ;;  %s2983_s2 = inlined_call_operand.vmem [shape: f32[1,128], index: 2, kind: input, shape index: {}]   ;;  %s2984_s3 = inlined_call_operand.vmem [shape: f32[1,128], index: 3, kind: input, shape index: {}]   ;;  %s2985_s4 = inlined_call_operand.hbm [shape: bf16[464,128], index: 4, kind: output, shape index: {}]  }
   0x1   :  { %10 = vsyncpa [#allocation6], 0 }
   0x2   :  { %11 = vsyncpa [#allocation4], 0  ;;  %s2696_s15 = smov [#allocation2]   ;;  %s2624_s19 = scalar_lea.hbm %s2981_s0, 11136 }
   0x3   :  { %s17_s16 = sshll.u32 %s2696_s15, 4  ;;  %p2625_p0 = scmp.ne.s32.totalorder %s2981_s0, %s2624_s19  ;;  %s18_s16 = int_to_ptr.vmem [resolvable:$true] %s17_s16 }
   0x4   :  { %p2628_p1 = scmp.lt.u32.totalorder %s2624_s19, %s2981_s0 }
   0x6   :  { %p2630_p2 = pnand %p2628_p1, %p2625_p0 }
   0x8   :  { %2633 = shalt.err (!%p2630_p2)
}
   0x9   :  { %s2634_s24 = scalar_lea.vmem %s18_s16, 11136  ;;  %p2639_p4 = scmp.lt.s32.totalorder %s18_s16, %s18_s16 }
   0xa   :  { %p2635_p3 = scmp.ne.s32.totalorder %s18_s16, %s2634_s24  ;;  %p2640_p5 = scmp.lt.s32.totalorder %s2634_s24, %s2634_s24 }
   0xc   :  { %p2641_p6 = por %p2640_p5, %p2639_p4 }
   0xe   :  { %p2642_p7 = pnand %p2641_p6, %p2635_p3 }
  0x10   :  { %2645 = shalt.err (!%p2642_p7)
}
  0x11   :  { %s2697_s25 = smov 192   ;;  %s2698_s26 = smov 12  }
  0x12   :  { %23 = dma.hbm_to_vmem [thread:$0]  %s2981_s0, 11136, %s18_s16, [#allocation3], %s2697_s25, %s2697_s25, %s2698_s26  }
  0x13   :  { %s2699_s29 = smov [#allocation5]   ;;  %s2646_s7 = scalar_lea.hbm %s2982_s1, 3072 }
  0x14   :  { %s29_s30 = sshll.u32 %s2699_s29, 4  ;;  %p2647_p8 = scmp.ne.s32.totalorder %s2982_s1, %s2646_s7  ;;  %s30_s30 = int_to_ptr.vmem [resolvable:$true] %s29_s30 }
  0x15   :  { %p2650_p9 = scmp.lt.u32.totalorder %s2646_s7, %s2982_s1 }
  0x17   :  { %p2652_p10 = pnand %p2650_p9, %p2647_p8 }
  0x19   :  { %2655 = shalt.err (!%p2652_p10)
}
  0x1a   :  { %s2656_s12 = scalar_lea.vmem %s30_s30, 3072  ;;  %p2661_p12 = scmp.lt.s32.totalorder %s30_s30, %s30_s30 }
  0x1b   :  { %p2657_p11 = scmp.ne.s32.totalorder %s30_s30, %s2656_s12  ;;  %p2662_p13 = scmp.lt.s32.totalorder %s2656_s12, %s2656_s12 }
  0x1d   :  { %p2663_p0 = por %p2662_p13, %p2661_p12 }
  0x1f   :  { %p2664_p1 = pnand %p2663_p0, %p2657_p11 }
  0x21   :  { %2667 = shalt.err (!%p2664_p1)
}
  0x22   :  { %s2700_s0 = smov 64   ;;  %s2701_s13 = smov 4  }
  0x23   :  { %35 = dma.hbm_to_vmem [thread:$0]  %s2982_s1, 3072, %s30_s30, [#allocation6], %s2700_s0, %s2700_s0, %s2701_s13  }
  0x24   :  { %2690 = dma.done.wait [#allocation3], 11136  }
  0x25   :  { %2691 = vsyncadd [#allocation3], 4294956160 }
  0x26   :  { %2692 = dma.done.wait [#allocation6], 3072  }
  0x27   :  { %2693 = vsyncadd [#allocation6], 4294964224  ;;  %v2702_v0 = vmov 0   ;;  %v2703_v1 = vmov 0.0   ;;  %vm2704_vm0 = vmmov 0   ;;  %v2484_v2 = vld [vmem:[#allocation5] sm:$0xff]  }
  0x28   :  { %819 = vmatprep.subr.bf16.mxu1 %v2702_v0  ;;  %2284 = vmatprep.subr.bf16.mxu0 %v2703_v1  ;;  %v2485_v3 = vld [vmem:[#allocation5 + $0x8] sm:$0xff]   ;;  %v2486_v4 = vld [vmem:[#allocation5 + $0x10] sm:$0xff]   ;;  %v2492_v5 = vld [vmem:[#allocation5 + $0x80] sm:$0xff]  }
  0x29   :  { %2300 = vmatprep.mubr.msk.bf16.mxu0 %vm2704_vm0, %v2703_v1  ;;  %820 = vmatpush1.bf16.msra.mxu1 %v2484_v2  ;;  %v2487_v6 = vld [vmem:[#allocation5 + $0x18] sm:$0xff]   ;;  %v2494_v7 = vld [vmem:[#allocation5 + $0x88] sm:$0xff]   ;;  %v2488_v8 = vld [vmem:[#allocation5 + $0x20] sm:$0xff]  }
  0x2a   :  { %821 = vmatprep.subr.bf16.mxu1 %v2702_v0  ;;  %2285 = vmatpush3.bf16.msra.mxu0 %v2492_v5  ;;  %v2496_v9 = vld [vmem:[#allocation5 + $0x90] sm:$0xff]   ;;  %v2489_v10 = vld [vmem:[#allocation5 + $0x28] sm:$0xff]   ;;  %v2498_v11 = vld [vmem:[#allocation5 + $0x98] sm:$0xff]  }
  0x2b   :  { %2286 = vmatprep.subr.bf16.mxu0 %v2703_v1  ;;  %v2490_v12 = vld [vmem:[#allocation5 + $0x30] sm:$0xff]   ;;  %v2500_v13 = vld [vmem:[#allocation5 + $0xa0] sm:$0xff]   ;;  %v2491_v14 = vld [vmem:[#allocation5 + $0x38] sm:$0xff]  }
  0x2c   :  { %v2502_v15 = vld [vmem:[#allocation5 + $0xa8] sm:$0xff]   ;;  %v2493_v17 = vld [vmem:[#allocation5 + $0x40] sm:$0xff]   ;;  %v2504_v18 = vld [vmem:[#allocation5 + $0xb0] sm:$0xff]  }
  0x2d   :  { %822 = vmatpush1.bf16.msra.mxu1 %v2485_v3  ;;  %v2511_v16 = vld [vmem:[#allocation2 + $0x4] ss:$12 sps:$4 sm:$0xff]   ;;  %v2508_v21 = vld [vmem:[#allocation2 + $0x8] ss:$12 sps:$4 sm:$0xff]   ;;  %v2512_v24 = vld [vmem:[#allocation2 + $0x20] ss:$12 sps:$4 sm:$0xff]  }
  0x2e   :  { %823 = vmatprep.subr.bf16.mxu1 %v2702_v0  ;;  %2287 = vmatpush3.bf16.msra.mxu0 %v2494_v7  ;;  %v2495_v19 = vld [vmem:[#allocation5 + $0x48] sm:$0xff]   ;;  %v2506_v20 = vld [vmem:[#allocation5 + $0xb8] sm:$0xff]   ;;  %v2497_v22 = vld [vmem:[#allocation5 + $0x50] sm:$0xff]  }
  0x2f   :  { %2288 = vmatprep.subr.bf16.mxu0 %v2703_v1  ;;  %851 = vmatprep.mubr.bf16.mxu1 %v2511_v16  ;;  %v2499_v23 = vld [vmem:[#allocation5 + $0x58] sm:$0xff]   ;;  %v2501_v25 = vld [vmem:[#allocation5 + $0x60] sm:$0xff]   ;;  %v2503_v26 = vld [vmem:[#allocation5 + $0x68] sm:$0xff]  }
  0x30   :  { %v2516_v27 = vld [vmem:[#allocation2 + $0x38] ss:$12 sps:$4 sm:$0xff]   ;;  %v2505_v28 = vld [vmem:[#allocation5 + $0x70] sm:$0xff]   ;;  %v2507_v29 = vld [vmem:[#allocation5 + $0x78] sm:$0xff]  }
  0x31   :  { %824 = vmatpush1.bf16.msra.mxu1 %v2486_v4  ;;  %v2509_v30 = vld [vmem:[#allocation2] ss:$12 sps:$4 sm:$0xff]   ;;  %v2520_v31 = vld [vmem:[#allocation2 + $0x50] ss:$12 sps:$4 sm:$0xff]   ;;  %v2515_v33 = vld [vmem:[#allocation2 + $0x18] ss:$12 sps:$4 sm:$0xff]  }
  0x32   :  { %825 = vmatprep.subr.bf16.mxu1 %v2702_v0  ;;  %2289 = vmatpush3.bf16.msra.mxu0 %v2496_v9  ;;  %v2513_v32 = vld [vmem:[#allocation2 + $0x1c] ss:$12 sps:$4 sm:$0xff]   ;;  %v2517_v35 = vld [vmem:[#allocation2 + $0x34] ss:$12 sps:$4 sm:$0xff]   ;;  %v2521_v38 = vld [vmem:[#allocation2 + $0x4c] ss:$12 sps:$4 sm:$0xff]  }
  0x33   :  { %2290 = vmatprep.subr.bf16.mxu0 %v2703_v1  ;;  %v2524_v34 = vld [vmem:[#allocation2 + $0x68] ss:$12 sps:$4 sm:$0xff]   ;;  %v2519_v36 = vld [vmem:[#allocation2 + $0x30] ss:$12 sps:$4 sm:$0xff]   ;;  %v2528_v37 = vld [vmem:[#allocation2 + $0x80] ss:$12 sps:$4 sm:$0xff]  }
  0x34   :  { %v2523_v39 = vld [vmem:[#allocation2 + $0x48] ss:$12 sps:$4 sm:$0xff]   ;;  %v2532_v40 = vld [vmem:[#allocation2 + $0x98] ss:$12 sps:$4 sm:$0xff]   ;;  %v2527_v42 = vld [vmem:[#allocation2 + $0x60] ss:$12 sps:$4 sm:$0xff]  }
  0x35   :  { %826 = vmatpush1.bf16.msra.mxu1 %v2487_v6  ;;  %v2525_v41 = vld [vmem:[#allocation2 + $0x64] ss:$12 sps:$4 sm:$0xff]   ;;  %v2529_v44 = vld [vmem:[#allocation2 + $0x7c] ss:$12 sps:$4 sm:$0xff]   ;;  %v2533_v47 = vld [vmem:[#allocation2 + $0x94] ss:$12 sps:$4 sm:$0xff]  }
  0x36   :  { %827 = vmatprep.subr.bf16.mxu1 %v2702_v0  ;;  %2291 = vmatpush3.bf16.msra.mxu0 %v2498_v11  ;;  %v2536_v43 = vld [vmem:[#allocation2 + $0xb0] ss:$12 sps:$4 sm:$0xff]   ;;  %v2531_v45 = vld [vmem:[#allocation2 + $0x78] ss:$12 sps:$4 sm:$0xff]   ;;  %v2540_v46 = vld [vmem:[#allocation2 + $0xc8] ss:$12 sps:$4 sm:$0xff]  }
  0x37   :  { %2292 = vmatprep.subr.bf16.mxu0 %v2703_v1  ;;  %v2535_v48 = vld [vmem:[#allocation2 + $0x90] ss:$12 sps:$4 sm:$0xff]   ;;  %v2544_v49 = vld [vmem:[#allocation2 + $0xe0] ss:$12 sps:$4 sm:$0xff]   ;;  %v2539_v51 = vld [vmem:[#allocation2 + $0xa8] ss:$12 sps:$4 sm:$0xff]  }
  0x38   :  { %v2537_v50 = vld [vmem:[#allocation2 + $0xac] ss:$12 sps:$4 sm:$0xff]   ;;  %v2541_v53 = vld [vmem:[#allocation2 + $0xc4] ss:$12 sps:$4 sm:$0xff]   ;;  %v2545_v56 = vld [vmem:[#allocation2 + $0xdc] ss:$12 sps:$4 sm:$0xff]  }
  0x39   :  { %828 = vmatpush1.bf16.msra.mxu1 %v2488_v8  ;;  %v2548_v52 = vld [vmem:[#allocation2 + $0xf8] ss:$12 sps:$4 sm:$0xff]   ;;  %v2543_v54 = vld [vmem:[#allocation2 + $0xc0] ss:$12 sps:$4 sm:$0xff]   ;;  %v2552_v55 = vld [vmem:[#allocation2 + $0x110] ss:$12 sps:$4 sm:$0xff]  }
  0x3a   :  { %829 = vmatprep.subr.bf16.mxu1 %v2702_v0  ;;  %2293 = vmatpush3.bf16.msra.mxu0 %v2500_v13  ;;  %v2547_v57 = vld [vmem:[#allocation2 + $0xd8] ss:$12 sps:$4 sm:$0xff]   ;;  %v2556_v58 = vld [vmem:[#allocation2 + $0x128] ss:$12 sps:$4 sm:$0xff]   ;;  %v2551_v60 = vld [vmem:[#allocation2 + $0xf0] ss:$12 sps:$4 sm:$0xff]  }
  0x3b   :  { %2294 = vmatprep.subr.bf16.mxu0 %v2703_v1  ;;  %v2549_v59 = vld [vmem:[#allocation2 + $0xf4] ss:$12 sps:$4 sm:$0xff]   ;;  %v2553_v62 = vld [vmem:[#allocation2 + $0x10c] ss:$12 sps:$4 sm:$0xff]   ;;  %v2557_v2 = vld [vmem:[#allocation2 + $0x124] ss:$12 sps:$4 sm:$0xff]  }
  0x3c   :  { %v2560_v61 = vld [vmem:[#allocation2 + $0x140] ss:$12 sps:$4 sm:$0xff]   ;;  %v2555_v63 = vld [vmem:[#allocation2 + $0x108] ss:$12 sps:$4 sm:$0xff]   ;;  %v2568_v4 = vld [vmem:[#allocation2 + $0x170] ss:$12 sps:$4 sm:$0xff]  }
  0x3d   :  { %830 = vmatpush1.bf16.msra.mxu1 %v2489_v10  ;;  %v2559_v3 = vld [vmem:[#allocation2 + $0x120] ss:$12 sps:$4 sm:$0xff]   ;;  %v2561_v5 = vld [vmem:[#allocation2 + $0x13c] ss:$12 sps:$4 sm:$0xff]   ;;  %v2563_v6 = vld [vmem:[#allocation2 + $0x138] ss:$12 sps:$4 sm:$0xff]  }
  0x3e   :  { %831 = vmatprep.subr.bf16.mxu1 %v2702_v0  ;;  %2295 = vmatpush3.bf16.msra.mxu0 %v2502_v15  ;;  %v2572_v7 = vld [vmem:[#allocation2 + $0x188] ss:$12 sps:$4 sm:$0xff]   ;;  %v2567_v9 = vld [vmem:[#allocation2 + $0x150] ss:$12 sps:$4 sm:$0xff]   ;;  %v2576_v10 = vld [vmem:[#allocation2 + $0x1a0] ss:$12 sps:$4 sm:$0xff]  }
  0x3f   :  { %2296 = vmatprep.subr.bf16.mxu0 %v2703_v1  ;;  %v2565_v8 = vld [vmem:[#allocation2 + $0x154] ss:$12 sps:$4 sm:$0xff]   ;;  %v2569_v11 = vld [vmem:[#allocation2 + $0x16c] ss:$12 sps:$4 sm:$0xff]   ;;  %v2584_v16 = vld [vmem:[#allocation2 + $0x1d0] ss:$12 sps:$4 sm:$0xff]  }
  0x40   :  { %v2580_v13 = vld [vmem:[#allocation2 + $0x1b8] ss:$12 sps:$4 sm:$0xff]   ;;  %v2575_v15 = vld [vmem:[#allocation2 + $0x180] ss:$12 sps:$4 sm:$0xff]  }
  0x41   :  { %832 = vmatpush1.bf16.msra.mxu1 %v2490_v12  ;;  %v2571_v12 = vld [vmem:[#allocation2 + $0x168] ss:$12 sps:$4 sm:$0xff]  }
  0x42   :  { %833 = vmatprep.subr.bf16.mxu1 %v2702_v0  ;;  %2297 = vmatpush3.bf16.msra.mxu0 %v2504_v18  ;;  %v2579_v18 = vld [vmem:[#allocation2 + $0x198] ss:$12 sps:$4 sm:$0xff]  }
  0x43   :  { %2298 = vmatprep.subr.bf16.mxu0 %v2703_v1 }
  0x45   :  { %834 = vmatpush1.bf16.msra.mxu1 %v2491_v14  ;;  %v2573_v14 = vld [vmem:[#allocation2 + $0x184] ss:$12 sps:$4 sm:$0xff]  }
  0x46   :  { %835 = vmatprep.subr.bf16.mxu1 %v2702_v0  ;;  %2299 = vmatpush3.bf16.msra.mxu0 %v2506_v20  ;;  %v2581_v20 = vld [vmem:[#allocation2 + $0x1b4] ss:$12 sps:$4 sm:$0xff]  }
  0x49   :  { %836 = vmatpush1.bf16.msra.mxu1 %v2493_v17  ;;  %2301 = vmatmul.mubr.bf16.vlgmr.msra.gmra.mrb[0].mxu0 %v2508_v21  ;;  %v2577_v17 = vld [vmem:[#allocation2 + $0x19c] ss:$12 sps:$4 sm:$0xff]  }
  0x4a   :  { %837 = vmatprep.subr.bf16.mxu1 %v2702_v0  ;;  %2304 = vmatprep.mubr.msk.bf16.mxu0 %vm2704_vm0, %v2703_v1  ;;  %v2583_v21 = vld [vmem:[#allocation2 + $0x1b0] ss:$12 sps:$4 sm:$0xff]  }
  0x4d   :  { %838 = vmatpush1.bf16.msra.mxu1 %v2495_v19  ;;  %v2588_v19 = vld [vmem:[#allocation2 + $0x1e8] ss:$12 sps:$4 sm:$0xff]  }
  0x4e   :  { %839 = vmatprep.subr.bf16.mxu1 %v2702_v0 }
  0x51   :  { %840 = vmatpush1.bf16.msra.mxu1 %v2497_v22  ;;  %2305 = vmatmul.mubr.bf16.gmra.mrb[4].mxu0 %v2512_v24  ;;  %v2592_v22 = vld [vmem:[#allocation2 + $0x200] ss:$12 sps:$4 sm:$0xff]   ;;  %v2587_v24 = vld [vmem:[#allocation2 + $0x1c8] ss:$12 sps:$4 sm:$0xff]  }
  0x52   :  { %841 = vmatprep.subr.bf16.mxu1 %v2702_v0  ;;  %2308 = vmatprep.mubr.msk.bf16.mxu0 %vm2704_vm0, %v2703_v1 }
  0x55   :  { %842 = vmatpush1.bf16.msra.mxu1 %v2499_v23  ;;  %v2585_v23 = vld [vmem:[#allocation2 + $0x1cc] ss:$12 sps:$4 sm:$0xff]  }
  0x56   :  { %843 = vmatprep.subr.bf16.mxu1 %v2702_v0 }
  0x59   :  { %844 = vmatpush1.bf16.msra.mxu1 %v2501_v25  ;;  %2309 = vmatmul.mubr.bf16.gmra.mrb[8].mxu0 %v2516_v27  ;;  %v2596_v25 = vld [vmem:[#allocation2 + $0x218] ss:$12 sps:$4 sm:$0xff]   ;;  %v2591_v27 = vld [vmem:[#allocation2 + $0x1e0] ss:$12 sps:$4 sm:$0xff]  }
  0x5a   :  { %845 = vmatprep.subr.bf16.mxu1 %v2702_v0  ;;  %2312 = vmatprep.mubr.msk.bf16.mxu0 %vm2704_vm0, %v2703_v1 }
  0x5d   :  { %846 = vmatpush1.bf16.msra.mxu1 %v2503_v26  ;;  %v2589_v26 = vld [vmem:[#allocation2 + $0x1e4] ss:$12 sps:$4 sm:$0xff]  }
  0x5e   :  { %847 = vmatprep.subr.bf16.mxu1 %v2702_v0 }
  0x61   :  { %848 = vmatpush1.bf16.msra.mxu1 %v2505_v28  ;;  %2313 = vmatmul.mubr.bf16.gmra.mrb[12].mxu0 %v2520_v31  ;;  %v2600_v28 = vld [vmem:[#allocation2 + $0x230] ss:$12 sps:$4 sm:$0xff]   ;;  %v2604_v31 = vld [vmem:[#allocation2 + $0x248] ss:$12 sps:$4 sm:$0xff]  }
  0x62   :  { %849 = vmatprep.subr.bf16.mxu1 %v2702_v0  ;;  %2316 = vmatprep.mubr.msk.bf16.mxu0 %vm2704_vm0, %v2703_v1  ;;  %v2564_v0 = vld [vmem:[#allocation2 + $0x158] ss:$12 sps:$4 sm:$0xff]  }
  0x65   :  { %850 = vmatpush1.bf16.msra.mxu1 %v2507_v29  ;;  %v2593_v29 = vld [vmem:[#allocation2 + $0x1fc] ss:$12 sps:$4 sm:$0xff]  }
  0x68   :  { %852 = vmatmul.mubr.bf16.vlgmr.msra.gmra.mrb[0].mxu1 %v2509_v30  ;;  %v2595_v30 = vld [vmem:[#allocation2 + $0x1f8] ss:$12 sps:$4 sm:$0xff]  }
  0x69   :  { %859 = vmatprep.mubr.bf16.mxu1 %v2513_v32  ;;  %2317 = vmatmul.mubr.bf16.gmra.mrb[16].mxu0 %v2524_v34  ;;  %v2597_v32 = vld [vmem:[#allocation2 + $0x214] ss:$12 sps:$4 sm:$0xff]  }
  0x6a   :  { %2320 = vmatprep.mubr.msk.bf16.mxu0 %vm2704_vm0, %v2703_v1  ;;  %v2608_v34 = vld [vmem:[#allocation2 + $0x260] ss:$12 sps:$4 sm:$0xff]  }
  0x70   :  { %860 = vmatmul.mubr.bf16.gmra.mrb[4].mxu1 %v2515_v33  ;;  %v2599_v33 = vld [vmem:[#allocation2 + $0x210] ss:$12 sps:$4 sm:$0xff]  }
  0x71   :  { %867 = vmatprep.mubr.bf16.mxu1 %v2517_v35  ;;  %2321 = vmatmul.mubr.bf16.gmra.mrb[20].mxu0 %v2528_v37  ;;  %v2601_v35 = vld [vmem:[#allocation2 + $0x22c] ss:$12 sps:$4 sm:$0xff]  }
  0x72   :  { %2324 = vmatprep.mubr.msk.bf16.mxu0 %vm2704_vm0, %v2703_v1  ;;  %v2612_v37 = vld [vmem:[#allocation2 + $0x278] ss:$12 sps:$4 sm:$0xff]  }
  0x78   :  { %868 = vmatmul.mubr.bf16.gmra.mrb[8].mxu1 %v2519_v36  ;;  %v2603_v36 = vld [vmem:[#allocation2 + $0x228] ss:$12 sps:$4 sm:$0xff]  }
  0x79   :  { %875 = vmatprep.mubr.bf16.mxu1 %v2521_v38  ;;  %2325 = vmatmul.mubr.bf16.gmra.mrb[24].mxu0 %v2532_v40  ;;  %v2605_v38 = vld [vmem:[#allocation2 + $0x244] ss:$12 sps:$4 sm:$0xff]   ;;  %v2607_v40 = vld [vmem:[#allocation2 + $0x240] ss:$12 sps:$4 sm:$0xff]  }
  0x7a   :  { %2328 = vmatprep.mubr.msk.bf16.mxu0 %vm2704_vm0, %v2703_v1 }
  0x80   :  { %876 = vmatmul.mubr.bf16.gmra.mrb[12].mxu1 %v2523_v39 }
  0x81   :  { %883 = vmatprep.mubr.bf16.mxu1 %v2525_v41  ;;  %2329 = vmatmul.mubr.bf16.gmra.mrb[28].mxu0 %v2536_v43  ;;  %v2609_v43 = vld [vmem:[#allocation2 + $0x25c] ss:$12 sps:$4 sm:$0xff]  }
  0x82   :  { %2332 = vmatprep.mubr.msk.bf16.mxu0 %vm2704_vm0, %v2703_v1 }
  0x88   :  { %884 = vmatmul.mubr.bf16.gmra.mrb[16].mxu1 %v2527_v42  ;;  %v2616_v42 = vld [vmem:[#allocation2 + $0x290] ss:$12 sps:$4 sm:$0xff]  }
  0x89   :  { %891 = vmatprep.mubr.bf16.mxu1 %v2529_v44  ;;  %2333 = vmatmul.mubr.bf16.gmra.mrb[32].mxu0 %v2540_v46 }
  0x8a   :  { %2336 = vmatprep.mubr.msk.bf16.mxu0 %vm2704_vm0, %v2703_v1 }
  0x90   :  { %892 = vmatmul.mubr.bf16.gmra.mrb[20].mxu1 %v2531_v45 }
  0x91   :  { %899 = vmatprep.mubr.bf16.mxu1 %v2533_v47  ;;  %2337 = vmatmul.mubr.bf16.gmra.mrb[36].mxu0 %v2544_v49  ;;  %v2611_v47 = vld [vmem:[#allocation2 + $0x258] ss:$12 sps:$4 sm:$0xff]   ;;  %v2620_v49 = vld [vmem:[#allocation2 + $0x2a8] ss:$12 sps:$4 sm:$0xff]  }
  0x92   :  { %2340 = vmatprep.mubr.msk.bf16.mxu0 %vm2704_vm0, %v2703_v1 }
  0x98   :  { %900 = vmatmul.mubr.bf16.gmra.mrb[24].mxu1 %v2535_v48 }
  0x99   :  { %907 = vmatprep.mubr.bf16.mxu1 %v2537_v50  ;;  %2341 = vmatmul.mubr.bf16.gmra.mrb[40].mxu0 %v2548_v52  ;;  %v2613_v50 = vld [vmem:[#allocation2 + $0x274] ss:$12 sps:$4 sm:$0xff]  }
  0x9a   :  { %2344 = vmatprep.mubr.msk.bf16.mxu0 %vm2704_vm0, %v2703_v1 }
  0xa0   :  { %908 = vmatmul.mubr.bf16.gmra.mrb[28].mxu1 %v2539_v51 }
  0xa1   :  { %915 = vmatprep.mubr.bf16.mxu1 %v2541_v53  ;;  %2345 = vmatmul.mubr.bf16.gmra.mrb[44].mxu0 %v2552_v55 }
  0xa2   :  { %2348 = vmatprep.mubr.msk.bf16.mxu0 %vm2704_vm0, %v2703_v1 }
  0xa8   :  { %916 = vmatmul.mubr.bf16.gmra.mrb[32].mxu1 %v2543_v54  ;;  %v2615_v54 = vld [vmem:[#allocation2 + $0x270] ss:$12 sps:$4 sm:$0xff]  }
  0xa9   :  { %923 = vmatprep.mubr.bf16.mxu1 %v2545_v56  ;;  %2349 = vmatmul.mubr.bf16.gmra.mrb[48].mxu0 %v2556_v58  ;;  %v2617_v56 = vld [vmem:[#allocation2 + $0x28c] ss:$12 sps:$4 sm:$0xff]  }
  0xaa   :  { %2352 = vmatprep.mubr.msk.bf16.mxu0 %vm2704_vm0, %v2703_v1 }
  0xb0   :  { %924 = vmatmul.mubr.bf16.gmra.mrb[36].mxu1 %v2547_v57 }
  0xb1   :  { %931 = vmatprep.mubr.bf16.mxu1 %v2549_v59  ;;  %2353 = vmatmul.mubr.bf16.gmra.mrb[52].mxu0 %v2560_v61 }
  0xb2   :  { %2356 = vmatprep.mubr.msk.bf16.mxu0 %vm2704_vm0, %v2703_v1 }
  0xb8   :  { %932 = vmatmul.mubr.bf16.gmra.mrb[40].mxu1 %v2551_v60 }
  0xb9   :  { %939 = vmatprep.mubr.bf16.mxu1 %v2553_v62  ;;  %2357 = vmatmul.mubr.bf16.gmra.mrb[56].mxu0 %v2564_v0 }
  0xba   :  { %2360 = vmatprep.mubr.msk.bf16.mxu0 %vm2704_vm0, %v2703_v1 }
  0xc0   :  { %940 = vmatmul.mubr.bf16.gmra.mrb[44].mxu1 %v2555_v63  ;;  %v2619_v63 = vld [vmem:[#allocation2 + $0x288] ss:$12 sps:$4 sm:$0xff]  }
  0xc1   :  { %947 = vmatprep.mubr.bf16.mxu1 %v2557_v2  ;;  %2361 = vmatmul.mubr.bf16.gmra.mrb[60].mxu0 %v2568_v4  ;;  %v2848_v2 = vld [vmem:[%s2984_s3] ss:$0 sm:$0xff]  ;;  %v2621_v4 = vld [vmem:[#allocation2 + $0x2a4] ss:$12 sps:$4 sm:$0xff]  }
  0xc2   :  { %2364 = vmatprep.mubr.msk.bf16.mxu0 %vm2704_vm0, %v2703_v1 }
  0xc8   :  { %948 = vmatmul.mubr.bf16.gmra.mrb[48].mxu1 %v2559_v3 }
  0xc9   :  { %955 = vmatprep.mubr.bf16.mxu1 %v2561_v5  ;;  %2365 = vmatmul.mubr.bf16.gmra.mrb[64].mxu0 %v2572_v7 }
  0xca   :  { %2368 = vmatprep.mubr.msk.bf16.mxu0 %vm2704_vm0, %v2703_v1 }
  0xd0   :  { %956 = vmatmul.mubr.bf16.gmra.mrb[52].mxu1 %v2563_v6 }
  0xd1   :  { %963 = vmatprep.mubr.bf16.mxu1 %v2565_v8  ;;  %2369 = vmatmul.mubr.bf16.gmra.mrb[68].mxu0 %v2576_v10 }
  0xd2   :  { %2372 = vmatprep.mubr.msk.bf16.mxu0 %vm2704_vm0, %v2703_v1 }
  0xd8   :  { %964 = vmatmul.mubr.bf16.gmra.mrb[56].mxu1 %v2567_v9 }
  0xd9   :  { %971 = vmatprep.mubr.bf16.mxu1 %v2569_v11  ;;  %2373 = vmatmul.mubr.bf16.gmra.mrb[72].mxu0 %v2580_v13 }
  0xda   :  { %2376 = vmatprep.mubr.msk.bf16.mxu0 %vm2704_vm0, %v2703_v1 }
  0xe0   :  { %972 = vmatmul.mubr.bf16.gmra.mrb[60].mxu1 %v2571_v12 }
  0xe1   :  { %979 = vmatprep.mubr.bf16.mxu1 %v2573_v14  ;;  %2377 = vmatmul.mubr.bf16.gmra.mrb[76].mxu0 %v2584_v16 }
  0xe2   :  { %2380 = vmatprep.mubr.msk.bf16.mxu0 %vm2704_vm0, %v2703_v1 }
  0xe8   :  { %980 = vmatmul.mubr.bf16.gmra.mrb[64].mxu1 %v2575_v15 }
  0xe9   :  { %987 = vmatprep.mubr.bf16.mxu1 %v2577_v17  ;;  %2381 = vmatmul.mubr.bf16.gmra.mrb[80].mxu0 %v2588_v19  ;;  %v2623_v19 = vld [vmem:[#allocation2 + $0x2a0] ss:$12 sps:$4 sm:$0xff]  }
  0xea   :  { %2384 = vmatprep.mubr.msk.bf16.mxu0 %vm2704_vm0, %v2703_v1 }
  0xf0   :  { %988 = vmatmul.mubr.bf16.gmra.mrb[68].mxu1 %v2579_v18 }
  0xf1   :  { %995 = vmatprep.mubr.bf16.mxu1 %v2581_v20  ;;  %2385 = vmatmul.mubr.bf16.gmra.mrb[84].mxu0 %v2592_v22 }
  0xf2   :  { %2388 = vmatprep.mubr.msk.bf16.mxu0 %vm2704_vm0, %v2703_v1 }
  0xf8   :  { %996 = vmatmul.mubr.bf16.gmra.mrb[72].mxu1 %v2583_v21 }
  0xf9   :  { %1003 = vmatprep.mubr.bf16.mxu1 %v2585_v23  ;;  %2389 = vmatmul.mubr.bf16.gmra.mrb[88].mxu0 %v2596_v25 }
  0xfa   :  { %2392 = vmatprep.mubr.msk.bf16.mxu0 %vm2704_vm0, %v2703_v1 }
 0x100   :  { %1004 = vmatmul.mubr.bf16.gmra.mrb[76].mxu1 %v2587_v24 }
 0x101   :  { %1011 = vmatprep.mubr.bf16.mxu1 %v2589_v26  ;;  %2393 = vmatmul.mubr.bf16.gmra.mrb[92].mxu0 %v2600_v28 }
 0x102   :  { %2396 = vmatprep.mubr.msk.bf16.mxu0 %vm2704_vm0, %v2703_v1 }
 0x108   :  { %1012 = vmatmul.mubr.bf16.gmra.mrb[80].mxu1 %v2591_v27 }
 0x109   :  { %1019 = vmatprep.mubr.bf16.mxu1 %v2593_v29  ;;  %2397 = vmatmul.mubr.bf16.gmra.mrb[96].mxu0 %v2604_v31 }
 0x10a   :  { %2400 = vmatprep.mubr.msk.bf16.mxu0 %vm2704_vm0, %v2703_v1 }
 0x110   :  { %1020 = vmatmul.mubr.bf16.gmra.mrb[84].mxu1 %v2595_v30 }
 0x111   :  { %1027 = vmatprep.mubr.bf16.mxu1 %v2597_v32  ;;  %2401 = vmatmul.mubr.bf16.gmra.mrb[100].mxu0 %v2608_v34 }
 0x112   :  { %2404 = vmatprep.mubr.msk.bf16.mxu0 %vm2704_vm0, %v2703_v1 }
 0x118   :  { %1028 = vmatmul.mubr.bf16.gmra.mrb[88].mxu1 %v2599_v33 }
 0x119   :  { %1035 = vmatprep.mubr.bf16.mxu1 %v2601_v35  ;;  %2405 = vmatmul.mubr.bf16.gmra.mrb[104].mxu0 %v2612_v37 }
 0x11a   :  { %2408 = vmatprep.mubr.msk.bf16.mxu0 %vm2704_vm0, %v2703_v1 }
 0x11c   :  { %v1118_v39 = vpop.f32.mrb[0].mxu0 }
 0x11d   :  { %v2302_v41 = vpop.f32.mrb[1].mxu0 }
 0x11e   :  { %v1121_v44 = vpop.f32.mrb[2].mxu0 }
 0x11f   :  { %v2303_v45 = vpop.f32.mrb[3].mxu0 }
 0x120   :  { %1036 = vmatmul.mubr.bf16.gmra.mrb[92].mxu1 %v2603_v36 }
 0x121   :  { %1043 = vmatprep.mubr.bf16.mxu1 %v2605_v38  ;;  %2409 = vmatmul.mubr.bf16.gmra.mrb[108].mxu0 %v2616_v42 }
 0x122   :  { %2412 = vmatprep.mubr.msk.bf16.mxu0 %vm2704_vm0, %v2703_v1  ;;  %v2843_v1 = vld [vmem:[%s2983_s2] ss:$0 sm:$0xff]  ;;  %s2705_s2 = smov [#allocation7]  }
 0x123   :  { %s1832_s3 = sshll.u32 %s2705_s2, 4  ;;  %s1833_s3 = int_to_ptr.vmem [resolvable:$true] %s1832_s3 }
 0x124   :  { %v1126_v46 = vpop.f32.mrb[4].mxu0  ;;  %s2668_s19 = scalar_lea.vmem %s1833_s3, 3712  ;;  %p2673_p3 = scmp.lt.s32.totalorder %s1833_s3, %s1833_s3 }
 0x125   :  { %v2306_v48 = vpop.f32.mrb[5].mxu0  ;;  %p2669_p2 = scmp.ne.s32.totalorder %s1833_s3, %s2668_s19  ;;  %p2674_p4 = scmp.lt.s32.totalorder %s2668_s19, %s2668_s19 }
 0x126   :  { %v1129_v51 = vpop.f32.mrb[6].mxu0 }
 0x127   :  { %v2307_v52 = vpop.f32.mrb[7].mxu0  ;;  %p2675_p5 = por %p2674_p4, %p2673_p3 }
 0x128   :  { %1044 = vmatmul.mubr.bf16.gmra.mrb[96].mxu1 %v2607_v40 }
 0x129   :  { %1051 = vmatprep.mubr.bf16.mxu1 %v2609_v43  ;;  %2413 = vmatmul.mubr.bf16.gmra.mrb[112].mxu0 %v2620_v49  ;;  %p2676_p6 = pnand %p2675_p5, %p2669_p2 }
 0x12c   :  { %v1134_v53 = vpop.f32.mrb[8].mxu0 }
 0x12d   :  { %v2310_v55 = vpop.f32.mrb[9].mxu0 }
 0x12e   :  { %v1137_v57 = vpop.f32.mrb[10].mxu0 }
 0x12f   :  { %v2311_v58 = vpop.f32.mrb[11].mxu0 }
 0x130   :  { %1052 = vmatmul.mubr.bf16.gmra.mrb[100].mxu1 %v2611_v47 }
 0x131   :  { %1059 = vmatprep.mubr.bf16.mxu1 %v2613_v50 }
 0x134   :  { %v1142_v60 = vpop.f32.mrb[12].mxu0 }
 0x135   :  { %v2314_v0 = vpop.f32.mrb[13].mxu0 }
 0x136   :  { %v1145_v5 = vpop.f32.mrb[14].mxu0 }
 0x137   :  { %v2315_v9 = vpop.f32.mrb[15].mxu0 }
 0x138   :  { %1060 = vmatmul.mubr.bf16.gmra.mrb[104].mxu1 %v2615_v54 }
 0x139   :  { %1067 = vmatprep.mubr.bf16.mxu1 %v2617_v56 }
 0x13b   :  { %v853_v59 = vpop.f32.mrb[0].mxu1 }
 0x13c   :  { %v1119_v61 = vadd.f32 %v1118_v39, %v853_v59  ;;  %v855_v62 = vpop.f32.mrb[1].mxu1  ;;  %v1150_v14 = vpop.f32.mrb[16].mxu0 }
 0x13d   :  { %v856_v3 = vpop.f32.mrb[2].mxu1  ;;  %v2318_v20 = vpop.f32.mrb[17].mxu0 }
 0x13e   :  { %v1356_v6 = vmul.f32 %v2843_v1, %v1119_v61  ;;  %v1122_v7 = vadd.f32 %v1121_v44, %v856_v3  ;;  %v858_v8 = vpop.f32.mrb[3].mxu1  ;;  %v1153_v22 = vpop.f32.mrb[18].mxu0 }
 0x13f   :  { %v2319_v27 = vpop.f32.mrb[19].mxu0 }
 0x140   :  { %v1421_v10 = vadd.f32 %v2848_v2, %v1356_v6  ;;  %v1357_v11 = vmul.f32 %v2843_v1, %v1122_v7  ;;  %1068 = vmatmul.mubr.bf16.gmra.mrb[108].mxu1 %v2619_v63 }
 0x141   :  { %1075 = vmatprep.mubr.bf16.mxu1 %v2621_v4 }
 0x142   :  { %v1422_v12 = vadd.f32 %v2848_v2, %v1357_v11  ;;  %v1479_v15 = vmax.f32 %v1421_v10, 0.0 }
 0x143   :  { %v861_v13 = vpop.f32.mrb[4].mxu1 }
 0x144   :  { %v1480_v16 = vmax.f32 %v1422_v12, 0.0  ;;  %v1127_v17 = vadd.f32 %v1126_v46, %v861_v13  ;;  %v863_v18 = vpop.f32.mrb[5].mxu1  ;;  %v1158_v32 = vpop.f32.mrb[20].mxu0 }
 0x145   :  { %v864_v21 = vpop.f32.mrb[6].mxu1  ;;  %v2322_v37 = vpop.f32.mrb[21].mxu0 }
 0x146   :  { %v2077_v23 = vpack.c.bf16 %v1480_v16, %v1479_v15  ;;  %v1358_v24 = vmul.f32 %v2843_v1, %v1127_v17  ;;  %v1130_v25 = vadd.f32 %v1129_v51, %v864_v21  ;;  %v866_v26 = vpop.f32.mrb[7].mxu1  ;;  %v1161_v39 = vpop.f32.mrb[22].mxu0 }
 0x147   :  { %v2323_v44 = vpop.f32.mrb[23].mxu0 }
 0x148   :  { %2078 = vst [vmem:[#allocation7] sm:$0xff] %v2077_v23   ;;  %v1423_v28 = vadd.f32 %v2848_v2, %v1358_v24  ;;  %v1359_v29 = vmul.f32 %v2843_v1, %v1130_v25  ;;  %1076 = vmatmul.mubr.bf16.gmra.mrb[112].mxu1 %v2623_v19 }
 0x14a   :  { %v1424_v30 = vadd.f32 %v2848_v2, %v1359_v29  ;;  %v1481_v33 = vmax.f32 %v1423_v28, 0.0 }
 0x14b   :  { %v869_v31 = vpop.f32.mrb[8].mxu1 }
 0x14c   :  { %v1482_v34 = vmax.f32 %v1424_v30, 0.0  ;;  %v1135_v35 = vadd.f32 %v1134_v53, %v869_v31  ;;  %v871_v36 = vpop.f32.mrb[9].mxu1  ;;  %v1166_v49 = vpop.f32.mrb[24].mxu0 }
 0x14d   :  { %v872_v38 = vpop.f32.mrb[10].mxu1  ;;  %v2326_v54 = vpop.f32.mrb[25].mxu0 }
 0x14e   :  { %v2082_v40 = vpack.c.bf16 %v1482_v34, %v1481_v33  ;;  %v1360_v41 = vmul.f32 %v2843_v1, %v1135_v35  ;;  %v1138_v42 = vadd.f32 %v1137_v57, %v872_v38  ;;  %v874_v43 = vpop.f32.mrb[11].mxu1  ;;  %v1169_v56 = vpop.f32.mrb[26].mxu0 }
 0x14f   :  { %v2327_v62 = vpop.f32.mrb[27].mxu0 }
 0x150   :  { %2219 = vst [vmem:[#allocation7 + $0x8] sm:$0xff] %v2082_v40   ;;  %v1425_v45 = vadd.f32 %v2848_v2, %v1360_v41  ;;  %v1361_v46 = vmul.f32 %v2843_v1, %v1138_v42 }
 0x152   :  { %v1426_v47 = vadd.f32 %v2848_v2, %v1361_v46  ;;  %v1483_v50 = vmax.f32 %v1425_v45, 0.0 }
 0x153   :  { %v877_v48 = vpop.f32.mrb[12].mxu1 }
 0x154   :  { %v1484_v51 = vmax.f32 %v1426_v47, 0.0  ;;  %v1143_v52 = vadd.f32 %v1142_v60, %v877_v48  ;;  %v879_v53 = vpop.f32.mrb[13].mxu1  ;;  %v1174_v6 = vpop.f32.mrb[28].mxu0 }
 0x155   :  { %v880_v55 = vpop.f32.mrb[14].mxu1  ;;  %v2330_v10 = vpop.f32.mrb[29].mxu0 }
 0x156   :  { %v2087_v58 = vpack.c.bf16 %v1484_v51, %v1483_v50  ;;  %v1362_v57 = vmul.f32 %v2843_v1, %v1143_v52  ;;  %v1146_v59 = vadd.f32 %v1145_v5, %v880_v55  ;;  %v882_v61 = vpop.f32.mrb[15].mxu1  ;;  %v1177_v12 = vpop.f32.mrb[30].mxu0 }
 0x157   :  { %v2331_v17 = vpop.f32.mrb[31].mxu0 }
 0x158   :  { %2220 = vst [vmem:[#allocation7 + $0x10] sm:$0xff] %v2087_v58   ;;  %v1427_v63 = vadd.f32 %v2848_v2, %v1362_v57  ;;  %v1363_v0 = vmul.f32 %v2843_v1, %v1146_v59 }
 0x15a   :  { %v1428_v3 = vadd.f32 %v2848_v2, %v1363_v0  ;;  %v1485_v60 = vmax.f32 %v1427_v63, 0.0 }
 0x15b   :  { %v885_v4 = vpop.f32.mrb[16].mxu1 }
 0x15c   :  { %v1486_v7 = vmax.f32 %v1428_v3, 0.0  ;;  %v1151_v8 = vadd.f32 %v1150_v14, %v885_v4  ;;  %v887_v9 = vpop.f32.mrb[17].mxu1  ;;  %v1182_v23 = vpop.f32.mrb[32].mxu0 }
 0x15d   :  { %v888_v11 = vpop.f32.mrb[18].mxu1  ;;  %v2334_v27 = vpop.f32.mrb[33].mxu0 }
 0x15e   :  { %v2092_v13 = vpack.c.bf16 %v1486_v7, %v1485_v60  ;;  %v1364_v5 = vmul.f32 %v2843_v1, %v1151_v8  ;;  %v1154_v15 = vadd.f32 %v1153_v22, %v888_v11  ;;  %v890_v16 = vpop.f32.mrb[19].mxu1  ;;  %v1185_v29 = vpop.f32.mrb[34].mxu0 }
 0x15f   :  { %v2335_v34 = vpop.f32.mrb[35].mxu0 }
 0x160   :  { %2221 = vst [vmem:[#allocation7 + $0x18] sm:$0xff] %v2092_v13   ;;  %v1429_v18 = vadd.f32 %v2848_v2, %v1364_v5  ;;  %v1365_v19 = vmul.f32 %v2843_v1, %v1154_v15 }
 0x162   :  { %v1430_v20 = vadd.f32 %v2848_v2, %v1365_v19  ;;  %v1487_v14 = vmax.f32 %v1429_v18, 0.0 }
 0x163   :  { %v893_v21 = vpop.f32.mrb[20].mxu1 }
 0x164   :  { %v1488_v24 = vmax.f32 %v1430_v20, 0.0  ;;  %v1159_v25 = vadd.f32 %v1158_v32, %v893_v21  ;;  %v895_v26 = vpop.f32.mrb[21].mxu1  ;;  %v1190_v40 = vpop.f32.mrb[36].mxu0 }
 0x165   :  { %v896_v28 = vpop.f32.mrb[22].mxu1  ;;  %v2338_v44 = vpop.f32.mrb[37].mxu0 }
 0x166   :  { %v2097_v30 = vpack.c.bf16 %v1488_v24, %v1487_v14  ;;  %v1366_v22 = vmul.f32 %v2843_v1, %v1159_v25  ;;  %v1162_v31 = vadd.f32 %v1161_v39, %v896_v28  ;;  %v898_v33 = vpop.f32.mrb[23].mxu1  ;;  %v1193_v46 = vpop.f32.mrb[38].mxu0 }
 0x167   :  { %v2339_v51 = vpop.f32.mrb[39].mxu0 }
 0x168   :  { %2222 = vst [vmem:[#allocation7 + $0x20] sm:$0xff] %v2097_v30   ;;  %v1431_v35 = vadd.f32 %v2848_v2, %v1366_v22  ;;  %v1367_v36 = vmul.f32 %v2843_v1, %v1162_v31 }
 0x16a   :  { %v1432_v37 = vadd.f32 %v2848_v2, %v1367_v36  ;;  %v1489_v32 = vmax.f32 %v1431_v35, 0.0 }
 0x16b   :  { %v901_v38 = vpop.f32.mrb[24].mxu1 }
 0x16c   :  { %v1490_v41 = vmax.f32 %v1432_v37, 0.0  ;;  %v1167_v42 = vadd.f32 %v1166_v49, %v901_v38  ;;  %v903_v43 = vpop.f32.mrb[25].mxu1  ;;  %v1198_v58 = vpop.f32.mrb[40].mxu0 }
 0x16d   :  { %v904_v45 = vpop.f32.mrb[26].mxu1  ;;  %v2342_v62 = vpop.f32.mrb[41].mxu0 }
 0x16e   :  { %v2102_v47 = vpack.c.bf16 %v1490_v41, %v1489_v32  ;;  %v1368_v39 = vmul.f32 %v2843_v1, %v1167_v42  ;;  %v1170_v48 = vadd.f32 %v1169_v56, %v904_v45  ;;  %v906_v50 = vpop.f32.mrb[27].mxu1  ;;  %v1201_v0 = vpop.f32.mrb[42].mxu0 }
 0x16f   :  { %v2343_v7 = vpop.f32.mrb[43].mxu0 }
 0x170   :  { %2223 = vst [vmem:[#allocation7 + $0x28] sm:$0xff] %v2102_v47   ;;  %v1433_v52 = vadd.f32 %v2848_v2, %v1368_v39  ;;  %v1369_v53 = vmul.f32 %v2843_v1, %v1170_v48 }
 0x172   :  { %v1434_v54 = vadd.f32 %v2848_v2, %v1369_v53  ;;  %v1491_v49 = vmax.f32 %v1433_v52, 0.0 }
 0x173   :  { %v909_v55 = vpop.f32.mrb[28].mxu1 }
 0x174   :  { %v1492_v57 = vmax.f32 %v1434_v54, 0.0  ;;  %v1175_v59 = vadd.f32 %v1174_v6, %v909_v55  ;;  %v911_v61 = vpop.f32.mrb[29].mxu1  ;;  %v1206_v13 = vpop.f32.mrb[44].mxu0 }
 0x175   :  { %v912_v63 = vpop.f32.mrb[30].mxu1  ;;  %v2346_v17 = vpop.f32.mrb[45].mxu0 }
 0x176   :  { %v2107_v3 = vpack.c.bf16 %v1492_v57, %v1491_v49  ;;  %v1370_v56 = vmul.f32 %v2843_v1, %v1175_v59  ;;  %v1178_v4 = vadd.f32 %v1177_v12, %v912_v63  ;;  %v914_v60 = vpop.f32.mrb[31].mxu1  ;;  %v1209_v19 = vpop.f32.mrb[46].mxu0 }
 0x177   :  { %v2347_v24 = vpop.f32.mrb[47].mxu0 }
 0x178   :  { %2224 = vst [vmem:[#allocation7 + $0x30] sm:$0xff] %v2107_v3   ;;  %v1435_v8 = vadd.f32 %v2848_v2, %v1370_v56  ;;  %v1371_v9 = vmul.f32 %v2843_v1, %v1178_v4 }
 0x17a   :  { %v1436_v10 = vadd.f32 %v2848_v2, %v1371_v9  ;;  %v1493_v6 = vmax.f32 %v1435_v8, 0.0 }
 0x17b   :  { %v917_v11 = vpop.f32.mrb[32].mxu1 }
 0x17c   :  { %v1494_v5 = vmax.f32 %v1436_v10, 0.0  ;;  %v1183_v15 = vadd.f32 %v1182_v23, %v917_v11  ;;  %v919_v16 = vpop.f32.mrb[33].mxu1  ;;  %v1214_v30 = vpop.f32.mrb[48].mxu0 }
 0x17d   :  { %v920_v18 = vpop.f32.mrb[34].mxu1  ;;  %v2350_v34 = vpop.f32.mrb[49].mxu0 }
 0x17e   :  { %v2112_v20 = vpack.c.bf16 %v1494_v5, %v1493_v6  ;;  %v1372_v12 = vmul.f32 %v2843_v1, %v1183_v15  ;;  %v1186_v21 = vadd.f32 %v1185_v29, %v920_v18  ;;  %v922_v14 = vpop.f32.mrb[35].mxu1  ;;  %v1217_v36 = vpop.f32.mrb[50].mxu0 }
 0x17f   :  { %v2351_v41 = vpop.f32.mrb[51].mxu0 }
 0x180   :  { %2225 = vst [vmem:[#allocation7 + $0x38] sm:$0xff] %v2112_v20   ;;  %v1437_v25 = vadd.f32 %v2848_v2, %v1372_v12  ;;  %v1373_v26 = vmul.f32 %v2843_v1, %v1186_v21 }
 0x182   :  { %v1438_v27 = vadd.f32 %v2848_v2, %v1373_v26  ;;  %v1495_v23 = vmax.f32 %v1437_v25, 0.0 }
 0x183   :  { %v925_v28 = vpop.f32.mrb[36].mxu1 }
 0x184   :  { %v1496_v22 = vmax.f32 %v1438_v27, 0.0  ;;  %v1191_v31 = vadd.f32 %v1190_v40, %v925_v28  ;;  %v927_v33 = vpop.f32.mrb[37].mxu1  ;;  %v1222_v47 = vpop.f32.mrb[52].mxu0 }
 0x185   :  { %v928_v35 = vpop.f32.mrb[38].mxu1  ;;  %v2354_v51 = vpop.f32.mrb[53].mxu0 }
 0x186   :  { %v2117_v37 = vpack.c.bf16 %v1496_v22, %v1495_v23  ;;  %v1374_v29 = vmul.f32 %v2843_v1, %v1191_v31  ;;  %v1194_v38 = vadd.f32 %v1193_v46, %v928_v35  ;;  %v930_v32 = vpop.f32.mrb[39].mxu1  ;;  %v1225_v53 = vpop.f32.mrb[54].mxu0 }
 0x187   :  { %v2355_v57 = vpop.f32.mrb[55].mxu0 }
 0x188   :  { %2226 = vst [vmem:[#allocation7 + $0x40] sm:$0xff] %v2117_v37   ;;  %v1439_v42 = vadd.f32 %v2848_v2, %v1374_v29  ;;  %v1375_v43 = vmul.f32 %v2843_v1, %v1194_v38 }
 0x18a   :  { %v1440_v44 = vadd.f32 %v2848_v2, %v1375_v43  ;;  %v1497_v40 = vmax.f32 %v1439_v42, 0.0 }
 0x18b   :  { %v933_v45 = vpop.f32.mrb[40].mxu1 }
 0x18c   :  { %v1498_v39 = vmax.f32 %v1440_v44, 0.0  ;;  %v1199_v48 = vadd.f32 %v1198_v58, %v933_v45  ;;  %v935_v50 = vpop.f32.mrb[41].mxu1  ;;  %v1230_v3 = vpop.f32.mrb[56].mxu0 }
 0x18d   :  { %v936_v52 = vpop.f32.mrb[42].mxu1  ;;  %v2358_v7 = vpop.f32.mrb[57].mxu0 }
 0x18e   :  { %v2122_v54 = vpack.c.bf16 %v1498_v39, %v1497_v40  ;;  %v1376_v46 = vmul.f32 %v2843_v1, %v1199_v48  ;;  %v1202_v55 = vadd.f32 %v1201_v0, %v936_v52  ;;  %v938_v49 = vpop.f32.mrb[43].mxu1  ;;  %v1233_v9 = vpop.f32.mrb[58].mxu0 }
 0x18f   :  { %v2359_v5 = vpop.f32.mrb[59].mxu0 }
 0x190   :  { %2227 = vst [vmem:[#allocation7 + $0x48] sm:$0xff] %v2122_v54   ;;  %v1441_v59 = vadd.f32 %v2848_v2, %v1376_v46  ;;  %v1377_v61 = vmul.f32 %v2843_v1, %v1202_v55 }
 0x192   :  { %v1442_v62 = vadd.f32 %v2848_v2, %v1377_v61  ;;  %v1499_v58 = vmax.f32 %v1441_v59, 0.0 }
 0x193   :  { %v941_v63 = vpop.f32.mrb[44].mxu1 }
 0x194   :  { %v1500_v56 = vmax.f32 %v1442_v62, 0.0  ;;  %v1207_v4 = vadd.f32 %v1206_v13, %v941_v63  ;;  %v943_v60 = vpop.f32.mrb[45].mxu1  ;;  %v1238_v20 = vpop.f32.mrb[60].mxu0 }
 0x195   :  { %v944_v8 = vpop.f32.mrb[46].mxu1  ;;  %v2362_v24 = vpop.f32.mrb[61].mxu0 }
 0x196   :  { %v2127_v10 = vpack.c.bf16 %v1500_v56, %v1499_v58  ;;  %v1378_v0 = vmul.f32 %v2843_v1, %v1207_v4  ;;  %v1210_v11 = vadd.f32 %v1209_v19, %v944_v8  ;;  %v946_v6 = vpop.f32.mrb[47].mxu1  ;;  %v1241_v26 = vpop.f32.mrb[62].mxu0 }
 0x197   :  { %v2363_v22 = vpop.f32.mrb[63].mxu0 }
 0x198   :  { %2228 = vst [vmem:[#allocation7 + $0x50] sm:$0xff] %v2127_v10   ;;  %v1443_v15 = vadd.f32 %v2848_v2, %v1378_v0  ;;  %v1379_v16 = vmul.f32 %v2843_v1, %v1210_v11 }
 0x19a   :  { %v1444_v17 = vadd.f32 %v2848_v2, %v1379_v16  ;;  %v1501_v13 = vmax.f32 %v1443_v15, 0.0 }
 0x19b   :  { %v949_v18 = vpop.f32.mrb[48].mxu1 }
 0x19c   :  { %v1502_v12 = vmax.f32 %v1444_v17, 0.0  ;;  %v1215_v21 = vadd.f32 %v1214_v30, %v949_v18  ;;  %v951_v14 = vpop.f32.mrb[49].mxu1  ;;  %v1246_v37 = vpop.f32.mrb[64].mxu0 }
 0x19d   :  { %v952_v25 = vpop.f32.mrb[50].mxu1  ;;  %v2366_v41 = vpop.f32.mrb[65].mxu0 }
 0x19e   :  { %v2132_v27 = vpack.c.bf16 %v1502_v12, %v1501_v13  ;;  %v1380_v19 = vmul.f32 %v2843_v1, %v1215_v21  ;;  %v1218_v28 = vadd.f32 %v1217_v36, %v952_v25  ;;  %v954_v23 = vpop.f32.mrb[51].mxu1  ;;  %v1249_v43 = vpop.f32.mrb[66].mxu0 }
 0x19f   :  { %v2367_v39 = vpop.f32.mrb[67].mxu0 }
 0x1a0   :  { %2229 = vst [vmem:[#allocation7 + $0x58] sm:$0xff] %v2132_v27   ;;  %v1445_v31 = vadd.f32 %v2848_v2, %v1380_v19  ;;  %v1381_v33 = vmul.f32 %v2843_v1, %v1218_v28 }
 0x1a2   :  { %v1446_v34 = vadd.f32 %v2848_v2, %v1381_v33  ;;  %v1503_v30 = vmax.f32 %v1445_v31, 0.0 }
 0x1a3   :  { %v957_v35 = vpop.f32.mrb[52].mxu1 }
 0x1a4   :  { %v1504_v29 = vmax.f32 %v1446_v34, 0.0  ;;  %v1223_v38 = vadd.f32 %v1222_v47, %v957_v35  ;;  %v959_v32 = vpop.f32.mrb[53].mxu1  ;;  %v1254_v54 = vpop.f32.mrb[68].mxu0 }
 0x1a5   :  { %v960_v42 = vpop.f32.mrb[54].mxu1  ;;  %v2370_v57 = vpop.f32.mrb[69].mxu0 }
 0x1a6   :  { %v2137_v44 = vpack.c.bf16 %v1504_v29, %v1503_v30  ;;  %v1382_v36 = vmul.f32 %v2843_v1, %v1223_v38  ;;  %v1226_v45 = vadd.f32 %v1225_v53, %v960_v42  ;;  %v962_v40 = vpop.f32.mrb[55].mxu1  ;;  %v1257_v61 = vpop.f32.mrb[70].mxu0 }
 0x1a7   :  { %v2371_v56 = vpop.f32.mrb[71].mxu0 }
 0x1a8   :  { %2230 = vst [vmem:[#allocation7 + $0x60] sm:$0xff] %v2137_v44   ;;  %v1447_v48 = vadd.f32 %v2848_v2, %v1382_v36  ;;  %v1383_v50 = vmul.f32 %v2843_v1, %v1226_v45 }
 0x1aa   :  { %v1448_v51 = vadd.f32 %v2848_v2, %v1383_v50  ;;  %v1505_v47 = vmax.f32 %v1447_v48, 0.0 }
 0x1ab   :  { %v965_v52 = vpop.f32.mrb[56].mxu1 }
 0x1ac   :  { %v1506_v46 = vmax.f32 %v1448_v51, 0.0  ;;  %v1231_v55 = vadd.f32 %v1230_v3, %v965_v52  ;;  %v967_v49 = vpop.f32.mrb[57].mxu1  ;;  %v1262_v10 = vpop.f32.mrb[72].mxu0 }
 0x1ad   :  { %v968_v59 = vpop.f32.mrb[58].mxu1  ;;  %v2374_v5 = vpop.f32.mrb[73].mxu0 }
 0x1ae   :  { %v2142_v62 = vpack.c.bf16 %v1506_v46, %v1505_v47  ;;  %v1384_v53 = vmul.f32 %v2843_v1, %v1231_v55  ;;  %v1234_v63 = vadd.f32 %v1233_v9, %v968_v59  ;;  %v970_v58 = vpop.f32.mrb[59].mxu1  ;;  %v1265_v16 = vpop.f32.mrb[74].mxu0 }
 0x1af   :  { %v2375_v12 = vpop.f32.mrb[75].mxu0 }
 0x1b0   :  { %2231 = vst [vmem:[#allocation7 + $0x68] sm:$0xff] %v2142_v62   ;;  %v1449_v4 = vadd.f32 %v2848_v2, %v1384_v53  ;;  %v1385_v60 = vmul.f32 %v2843_v1, %v1234_v63 }
 0x1b2   :  { %v1450_v7 = vadd.f32 %v2848_v2, %v1385_v60  ;;  %v1507_v3 = vmax.f32 %v1449_v4, 0.0 }
 0x1b3   :  { %v973_v8 = vpop.f32.mrb[60].mxu1 }
 0x1b4   :  { %v1508_v0 = vmax.f32 %v1450_v7, 0.0  ;;  %v1239_v11 = vadd.f32 %v1238_v20, %v973_v8  ;;  %v975_v6 = vpop.f32.mrb[61].mxu1  ;;  %v1270_v27 = vpop.f32.mrb[76].mxu0 }
 0x1b5   :  { %v976_v15 = vpop.f32.mrb[62].mxu1  ;;  %v2378_v22 = vpop.f32.mrb[77].mxu0 }
 0x1b6   :  { %v2147_v17 = vpack.c.bf16 %v1508_v0, %v1507_v3  ;;  %v1386_v9 = vmul.f32 %v2843_v1, %v1239_v11  ;;  %v1242_v18 = vadd.f32 %v1241_v26, %v976_v15  ;;  %v978_v13 = vpop.f32.mrb[63].mxu1  ;;  %v1273_v33 = vpop.f32.mrb[78].mxu0 }
 0x1b7   :  { %v2379_v29 = vpop.f32.mrb[79].mxu0 }
 0x1b8   :  { %2232 = vst [vmem:[#allocation7 + $0x70] sm:$0xff] %v2147_v17   ;;  %v1451_v21 = vadd.f32 %v2848_v2, %v1386_v9  ;;  %v1387_v14 = vmul.f32 %v2843_v1, %v1242_v18 }
 0x1ba   :  { %v1452_v24 = vadd.f32 %v2848_v2, %v1387_v14  ;;  %v1509_v20 = vmax.f32 %v1451_v21, 0.0 }
 0x1bb   :  { %v981_v25 = vpop.f32.mrb[64].mxu1 }
 0x1bc   :  { %v1510_v19 = vmax.f32 %v1452_v24, 0.0  ;;  %v1247_v28 = vadd.f32 %v1246_v37, %v981_v25  ;;  %v983_v23 = vpop.f32.mrb[65].mxu1  ;;  %v1278_v44 = vpop.f32.mrb[80].mxu0 }
 0x1bd   :  { %v984_v31 = vpop.f32.mrb[66].mxu1  ;;  %v2382_v39 = vpop.f32.mrb[81].mxu0 }
 0x1be   :  { %v2152_v34 = vpack.c.bf16 %v1510_v19, %v1509_v20  ;;  %v1388_v26 = vmul.f32 %v2843_v1, %v1247_v28  ;;  %v1250_v35 = vadd.f32 %v1249_v43, %v984_v31  ;;  %v986_v30 = vpop.f32.mrb[67].mxu1  ;;  %v1281_v50 = vpop.f32.mrb[82].mxu0 }
 0x1bf   :  { %v2383_v46 = vpop.f32.mrb[83].mxu0 }
 0x1c0   :  { %2233 = vst [vmem:[#allocation7 + $0x78] sm:$0xff] %v2152_v34   ;;  %v1453_v38 = vadd.f32 %v2848_v2, %v1388_v26  ;;  %v1389_v32 = vmul.f32 %v2843_v1, %v1250_v35 }
 0x1c2   :  { %v1454_v41 = vadd.f32 %v2848_v2, %v1389_v32  ;;  %v1511_v37 = vmax.f32 %v1453_v38, 0.0 }
 0x1c3   :  { %v989_v42 = vpop.f32.mrb[68].mxu1 }
 0x1c4   :  { %v1512_v36 = vmax.f32 %v1454_v41, 0.0  ;;  %v1255_v45 = vadd.f32 %v1254_v54, %v989_v42  ;;  %v991_v40 = vpop.f32.mrb[69].mxu1  ;;  %v1286_v62 = vpop.f32.mrb[84].mxu0 }
 0x1c5   :  { %v992_v48 = vpop.f32.mrb[70].mxu1  ;;  %v2386_v56 = vpop.f32.mrb[85].mxu0 }
 0x1c6   :  { %v2157_v51 = vpack.c.bf16 %v1512_v36, %v1511_v37  ;;  %v1390_v43 = vmul.f32 %v2843_v1, %v1255_v45  ;;  %v1258_v52 = vadd.f32 %v1257_v61, %v992_v48  ;;  %v994_v47 = vpop.f32.mrb[71].mxu1  ;;  %v1289_v60 = vpop.f32.mrb[86].mxu0 }
 0x1c7   :  { %v2387_v0 = vpop.f32.mrb[87].mxu0 }
 0x1c8   :  { %2234 = vst [vmem:[#allocation7 + $0x80] sm:$0xff] %v2157_v51   ;;  %v1455_v55 = vadd.f32 %v2848_v2, %v1390_v43  ;;  %v1391_v49 = vmul.f32 %v2843_v1, %v1258_v52 }
 0x1ca   :  { %v1456_v57 = vadd.f32 %v2848_v2, %v1391_v49  ;;  %v1513_v54 = vmax.f32 %v1455_v55, 0.0 }
 0x1cb   :  { %v997_v59 = vpop.f32.mrb[72].mxu1 }
 0x1cc   :  { %v1514_v53 = vmax.f32 %v1456_v57, 0.0  ;;  %v1263_v63 = vadd.f32 %v1262_v10, %v997_v59  ;;  %v999_v58 = vpop.f32.mrb[73].mxu1  ;;  %v1294_v17 = vpop.f32.mrb[88].mxu0 }
 0x1cd   :  { %v1000_v4 = vpop.f32.mrb[74].mxu1  ;;  %v2390_v12 = vpop.f32.mrb[89].mxu0 }
 0x1ce   :  { %v2162_v7 = vpack.c.bf16 %v1514_v53, %v1513_v54  ;;  %v1392_v61 = vmul.f32 %v2843_v1, %v1263_v63  ;;  %v1266_v8 = vadd.f32 %v1265_v16, %v1000_v4  ;;  %v1002_v3 = vpop.f32.mrb[75].mxu1  ;;  %v1297_v14 = vpop.f32.mrb[90].mxu0 }
 0x1cf   :  { %v2391_v19 = vpop.f32.mrb[91].mxu0 }
 0x1d0   :  { %2235 = vst [vmem:[#allocation7 + $0x88] sm:$0xff] %v2162_v7   ;;  %v1457_v11 = vadd.f32 %v2848_v2, %v1392_v61  ;;  %v1393_v6 = vmul.f32 %v2843_v1, %v1266_v8 }
 0x1d2   :  { %v1458_v5 = vadd.f32 %v2848_v2, %v1393_v6  ;;  %v1515_v10 = vmax.f32 %v1457_v11, 0.0 }
 0x1d3   :  { %v1005_v15 = vpop.f32.mrb[76].mxu1 }
 0x1d4   :  { %v1516_v9 = vmax.f32 %v1458_v5, 0.0  ;;  %v1271_v18 = vadd.f32 %v1270_v27, %v1005_v15  ;;  %v1007_v13 = vpop.f32.mrb[77].mxu1  ;;  %v1302_v34 = vpop.f32.mrb[92].mxu0 }
 0x1d5   :  { %v1008_v21 = vpop.f32.mrb[78].mxu1  ;;  %v2394_v29 = vpop.f32.mrb[93].mxu0 }
 0x1d6   :  { %v2167_v24 = vpack.c.bf16 %v1516_v9, %v1515_v10  ;;  %v1394_v16 = vmul.f32 %v2843_v1, %v1271_v18  ;;  %v1274_v25 = vadd.f32 %v1273_v33, %v1008_v21  ;;  %v1010_v20 = vpop.f32.mrb[79].mxu1  ;;  %v1305_v32 = vpop.f32.mrb[94].mxu0 }
 0x1d7   :  { %v2395_v36 = vpop.f32.mrb[95].mxu0 }
 0x1d8   :  { %2236 = vst [vmem:[#allocation7 + $0x90] sm:$0xff] %v2167_v24   ;;  %v1459_v28 = vadd.f32 %v2848_v2, %v1394_v16  ;;  %v1395_v23 = vmul.f32 %v2843_v1, %v1274_v25 }
 0x1da   :  { %v1460_v22 = vadd.f32 %v2848_v2, %v1395_v23  ;;  %v1517_v27 = vmax.f32 %v1459_v28, 0.0 }
 0x1db   :  { %v1013_v31 = vpop.f32.mrb[80].mxu1 }
 0x1dc   :  { %v1518_v26 = vmax.f32 %v1460_v22, 0.0  ;;  %v1279_v35 = vadd.f32 %v1278_v44, %v1013_v31  ;;  %v1015_v30 = vpop.f32.mrb[81].mxu1  ;;  %v1310_v51 = vpop.f32.mrb[96].mxu0 }
 0x1dd   :  { %v1016_v38 = vpop.f32.mrb[82].mxu1  ;;  %v2398_v46 = vpop.f32.mrb[97].mxu0 }
 0x1de   :  { %v2172_v41 = vpack.c.bf16 %v1518_v26, %v1517_v27  ;;  %v1396_v33 = vmul.f32 %v2843_v1, %v1279_v35  ;;  %v1282_v42 = vadd.f32 %v1281_v50, %v1016_v38  ;;  %v1018_v37 = vpop.f32.mrb[83].mxu1  ;;  %v1313_v49 = vpop.f32.mrb[98].mxu0 }
 0x1df   :  { %v2399_v53 = vpop.f32.mrb[99].mxu0 }
 0x1e0   :  { %2237 = vst [vmem:[#allocation7 + $0x98] sm:$0xff] %v2172_v41   ;;  %v1461_v45 = vadd.f32 %v2848_v2, %v1396_v33  ;;  %v1397_v40 = vmul.f32 %v2843_v1, %v1282_v42 }
 0x1e2   :  { %v1462_v39 = vadd.f32 %v2848_v2, %v1397_v40  ;;  %v1519_v44 = vmax.f32 %v1461_v45, 0.0 }
 0x1e3   :  { %v1021_v48 = vpop.f32.mrb[84].mxu1 }
 0x1e4   :  { %v1520_v43 = vmax.f32 %v1462_v39, 0.0  ;;  %v1287_v52 = vadd.f32 %v1286_v62, %v1021_v48  ;;  %v1023_v47 = vpop.f32.mrb[85].mxu1  ;;  %v1318_v7 = vpop.f32.mrb[100].mxu0 }
 0x1e5   :  { %v1024_v55 = vpop.f32.mrb[86].mxu1  ;;  %v2402_v0 = vpop.f32.mrb[101].mxu0 }
 0x1e6   :  { %v2177_v57 = vpack.c.bf16 %v1520_v43, %v1519_v44  ;;  %v1398_v50 = vmul.f32 %v2843_v1, %v1287_v52  ;;  %v1290_v59 = vadd.f32 %v1289_v60, %v1024_v55  ;;  %v1026_v54 = vpop.f32.mrb[87].mxu1  ;;  %v1321_v6 = vpop.f32.mrb[102].mxu0 }
 0x1e7   :  { %v2403_v9 = vpop.f32.mrb[103].mxu0 }
 0x1e8   :  { %2238 = vst [vmem:[#allocation7 + $0xa0] sm:$0xff] %v2177_v57   ;;  %v1463_v63 = vadd.f32 %v2848_v2, %v1398_v50  ;;  %v1399_v58 = vmul.f32 %v2843_v1, %v1290_v59 }
 0x1ea   :  { %v1464_v56 = vadd.f32 %v2848_v2, %v1399_v58  ;;  %v1521_v62 = vmax.f32 %v1463_v63, 0.0 }
 0x1eb   :  { %v1029_v4 = vpop.f32.mrb[88].mxu1 }
 0x1ec   :  { %v1522_v61 = vmax.f32 %v1464_v56, 0.0  ;;  %v1295_v8 = vadd.f32 %v1294_v17, %v1029_v4  ;;  %v1031_v3 = vpop.f32.mrb[89].mxu1  ;;  %v1326_v24 = vpop.f32.mrb[104].mxu0 }
 0x1ed   :  { %v1032_v11 = vpop.f32.mrb[90].mxu1  ;;  %v2406_v19 = vpop.f32.mrb[105].mxu0 }
 0x1ee   :  { %v2182_v5 = vpack.c.bf16 %v1522_v61, %v1521_v62  ;;  %v1400_v60 = vmul.f32 %v2843_v1, %v1295_v8  ;;  %v1298_v15 = vadd.f32 %v1297_v14, %v1032_v11  ;;  %v1034_v10 = vpop.f32.mrb[91].mxu1  ;;  %v1329_v23 = vpop.f32.mrb[106].mxu0 }
 0x1ef   :  { %v2407_v26 = vpop.f32.mrb[107].mxu0 }
 0x1f0   :  { %2239 = vst [vmem:[#allocation7 + $0xa8] sm:$0xff] %v2182_v5   ;;  %v1465_v18 = vadd.f32 %v2848_v2, %v1400_v60  ;;  %v1401_v13 = vmul.f32 %v2843_v1, %v1298_v15 }
 0x1f2   :  { %v1466_v12 = vadd.f32 %v2848_v2, %v1401_v13  ;;  %v1523_v17 = vmax.f32 %v1465_v18, 0.0 }
 0x1f3   :  { %v1037_v21 = vpop.f32.mrb[92].mxu1 }
 0x1f4   :  { %v1524_v16 = vmax.f32 %v1466_v12, 0.0  ;;  %v1303_v25 = vadd.f32 %v1302_v34, %v1037_v21  ;;  %v1039_v20 = vpop.f32.mrb[93].mxu1  ;;  %v1334_v41 = vpop.f32.mrb[108].mxu0 }
 0x1f5   :  { %v1040_v28 = vpop.f32.mrb[94].mxu1  ;;  %v2410_v36 = vpop.f32.mrb[109].mxu0 }
 0x1f6   :  { %v2187_v22 = vpack.c.bf16 %v1524_v16, %v1523_v17  ;;  %v1402_v14 = vmul.f32 %v2843_v1, %v1303_v25  ;;  %v1306_v31 = vadd.f32 %v1305_v32, %v1040_v28  ;;  %v1042_v27 = vpop.f32.mrb[95].mxu1  ;;  %v1337_v40 = vpop.f32.mrb[110].mxu0 }
 0x1f7   :  { %v2411_v43 = vpop.f32.mrb[111].mxu0 }
 0x1f8   :  { %2240 = vst [vmem:[#allocation7 + $0xb0] sm:$0xff] %v2187_v22   ;;  %v1467_v35 = vadd.f32 %v2848_v2, %v1402_v14  ;;  %v1403_v30 = vmul.f32 %v2843_v1, %v1306_v31 }
 0x1fa   :  { %v1468_v29 = vadd.f32 %v2848_v2, %v1403_v30  ;;  %v1525_v34 = vmax.f32 %v1467_v35, 0.0 }
 0x1fb   :  { %v1045_v38 = vpop.f32.mrb[96].mxu1 }
 0x1fc   :  { %v1526_v33 = vmax.f32 %v1468_v29, 0.0  ;;  %v1311_v42 = vadd.f32 %v1310_v51, %v1045_v38  ;;  %v1047_v37 = vpop.f32.mrb[97].mxu1  ;;  %v1342_v57 = vpop.f32.mrb[112].mxu0 }
 0x1fd   :  { %v1048_v45 = vpop.f32.mrb[98].mxu1  ;;  %v2414_v53 = vpop.f32.mrb[113].mxu0 }
 0x1fe   :  { %v2192_v39 = vpack.c.bf16 %v1526_v33, %v1525_v34  ;;  %v1404_v32 = vmul.f32 %v2843_v1, %v1311_v42  ;;  %v1314_v48 = vadd.f32 %v1313_v49, %v1048_v45  ;;  %v1050_v44 = vpop.f32.mrb[99].mxu1  ;;  %v1345_v58 = vpop.f32.mrb[114].mxu0 }
 0x1ff   :  { %v2415_v61 = vpop.f32.mrb[115].mxu0 }
 0x200   :  { %2241 = vst [vmem:[#allocation7 + $0xb8] sm:$0xff] %v2192_v39   ;;  %v1469_v52 = vadd.f32 %v2848_v2, %v1404_v32  ;;  %v1405_v47 = vmul.f32 %v2843_v1, %v1314_v48 }
 0x202   :  { %v1470_v46 = vadd.f32 %v2848_v2, %v1405_v47  ;;  %v1527_v51 = vmax.f32 %v1469_v52, 0.0 }
 0x203   :  { %v1053_v55 = vpop.f32.mrb[100].mxu1 }
 0x204   :  { %v1528_v50 = vmax.f32 %v1470_v46, 0.0  ;;  %v1319_v59 = vadd.f32 %v1318_v7, %v1053_v55  ;;  %v1055_v54 = vpop.f32.mrb[101].mxu1 }
 0x205   :  { %v1056_v63 = vpop.f32.mrb[102].mxu1 }
 0x206   :  { %v2197_v56 = vpack.c.bf16 %v1528_v50, %v1527_v51  ;;  %v1406_v49 = vmul.f32 %v2843_v1, %v1319_v59  ;;  %v1322_v4 = vadd.f32 %v1321_v6, %v1056_v63  ;;  %v1058_v62 = vpop.f32.mrb[103].mxu1 }
 0x208   :  { %2242 = vst [vmem:[#allocation7 + $0xc0] sm:$0xff] %v2197_v56   ;;  %v1471_v8 = vadd.f32 %v2848_v2, %v1406_v49  ;;  %v1407_v3 = vmul.f32 %v2843_v1, %v1322_v4 }
 0x20a   :  { %v1472_v0 = vadd.f32 %v2848_v2, %v1407_v3  ;;  %v1529_v5 = vmax.f32 %v1471_v8, 0.0 }
 0x20b   :  { %v1061_v11 = vpop.f32.mrb[104].mxu1 }
 0x20c   :  { %v1530_v7 = vmax.f32 %v1472_v0, 0.0  ;;  %v1327_v60 = vadd.f32 %v1326_v24, %v1061_v11  ;;  %v1063_v15 = vpop.f32.mrb[105].mxu1 }
 0x20d   :  { %v1064_v10 = vpop.f32.mrb[106].mxu1 }
 0x20e   :  { %v2202_v9 = vpack.c.bf16 %v1530_v7, %v1529_v5  ;;  %v1408_v18 = vmul.f32 %v2843_v1, %v1327_v60  ;;  %v1330_v13 = vadd.f32 %v1329_v23, %v1064_v10  ;;  %v1066_v6 = vpop.f32.mrb[107].mxu1 }
 0x210   :  { %2243 = vst [vmem:[#allocation7 + $0xc8] sm:$0xff] %v2202_v9   ;;  %v1473_v12 = vadd.f32 %v2848_v2, %v1408_v18  ;;  %v1409_v21 = vmul.f32 %v2843_v1, %v1330_v13 }
 0x212   :  { %v1474_v17 = vadd.f32 %v2848_v2, %v1409_v21  ;;  %v1531_v25 = vmax.f32 %v1473_v12, 0.0 }
 0x213   :  { %v1069_v16 = vpop.f32.mrb[108].mxu1 }
 0x214   :  { %v1532_v20 = vmax.f32 %v1474_v17, 0.0  ;;  %v1335_v19 = vadd.f32 %v1334_v41, %v1069_v16  ;;  %v1071_v28 = vpop.f32.mrb[109].mxu1 }
 0x215   :  { %v1072_v24 = vpop.f32.mrb[110].mxu1 }
 0x216   :  { %v2207_v22 = vpack.c.bf16 %v1532_v20, %v1531_v25  ;;  %v1410_v14 = vmul.f32 %v2843_v1, %v1335_v19  ;;  %v1338_v31 = vadd.f32 %v1337_v40, %v1072_v24  ;;  %v1074_v27 = vpop.f32.mrb[111].mxu1 }
 0x218   :  { %2244 = vst [vmem:[#allocation7 + $0xd0] sm:$0xff] %v2207_v22   ;;  %v1475_v23 = vadd.f32 %v2848_v2, %v1410_v14  ;;  %v1411_v26 = vmul.f32 %v2843_v1, %v1338_v31 }
 0x21a   :  { %v1476_v35 = vadd.f32 %v2848_v2, %v1411_v26  ;;  %v1533_v29 = vmax.f32 %v1475_v23, 0.0 }
 0x21b   :  { %v1077_v30 = vpop.f32.mrb[112].mxu1 }
 0x21c   :  { %v1534_v38 = vmax.f32 %v1476_v35, 0.0  ;;  %v1343_v34 = vadd.f32 %v1342_v57, %v1077_v30  ;;  %v1079_v33 = vpop.f32.mrb[113].mxu1 }
 0x21d   :  { %v1080_v41 = vpop.f32.mrb[114].mxu1 }
 0x21e   :  { %v2212_v42 = vpack.c.bf16 %v1534_v38, %v1533_v29  ;;  %v1412_v37 = vmul.f32 %v2843_v1, %v1343_v34  ;;  %v1346_v36 = vadd.f32 %v1345_v58, %v1080_v41  ;;  %v1082_v45 = vpop.f32.mrb[115].mxu1 }
 0x220   :  { %2245 = vst [vmem:[#allocation7 + $0xd8] sm:$0xff] %v2212_v42   ;;  %v1477_v40 = vadd.f32 %v2848_v2, %v1412_v37  ;;  %v1413_v39 = vmul.f32 %v2843_v1, %v1346_v36 }
 0x222   :  { %v1478_v32 = vadd.f32 %v2848_v2, %v1413_v39  ;;  %v1535_v48 = vmax.f32 %v1477_v40, 0.0 }
 0x224   :  { %v1536_v44 = vmax.f32 %v1478_v32, 0.0 }
 0x226   :  { %v2217_v43 = vpack.c.bf16 %v1536_v44, %v1535_v48 }
 0x228   :  { %2246 = vst [vmem:[#allocation7 + $0xe0] sm:$0xff] %v2217_v43  }
 0x229   :  { %2679 = shalt.err (!%p2676_p6)
}
 0x22a   :  { %s2680_s22 = scalar_lea.hbm %s2985_s4, 3712 }
 0x22b   :  { %p2681_p7 = scmp.ne.s32.totalorder %s2985_s4, %s2680_s22  ;;  %p2684_p8 = scmp.lt.u32.totalorder %s2680_s22, %s2985_s4 }
 0x22d   :  { %p2686_p9 = pnand %p2684_p8, %p2681_p7 }
 0x22f   :  { %2689 = shalt.err (!%p2686_p9)
}
 0x230   :  { %1838 = dma.vmem_to_hbm [thread:$0]  %s1833_s3, 3712, %s2985_s4, [#allocation4], %s2700_s0, %s2700_s0, %s2701_s13  }
 0x231   :  { %2694 = dma.done.wait [#allocation4], 3712  }
 0x232   :  { %2695 = vsyncadd [#allocation4], 4294963584 }
 0x233   :  { %1842 = vsyncpa [#allocation3], 1 }
 0x234   :  { %1843 = vsyncpa [#allocation6], 1 }
 0x235   :  { %1844 = vsyncpa [#allocation4], 1 }

</bundles_post_ra>
